<compile_context>
chip_gen: v7x
topology: tpu7x:2x2x1
jax: 0.10.0
libtpu: 0.0.40
codegen_flags: <defaults>
</compile_context>

<pallas_src>
import jax
import jax.numpy as jnp
from jax import lax
from jax.experimental import pallas as pl
from jax.experimental.pallas import tpu as pltpu

IMG_LEN = 1024
TXT_LEN = 300
TXT_PAD = 384              # 3 * 128: zero-padded text K dim (lane-dense)
H = 128                    # per-modality encoder width
D = 256                    # shared hidden / attention dim
QKV = 3 * D                # 768
N_CLASSES = 50
OUT_PAD = 128              # class dim padded to one full lane tile
BATCH = 8                  # rows per request (m); must be a multiple of 8
NEG_INF = -1e30
INV_SQRT_D = 1.0 / (D ** 0.5)   # 1/16

# packed weight-A (lane=128) row offsets
WA_IMG0 = 0
WA_TXT0 = IMG_LEN                       # 1024
WA_OUT0 = IMG_LEN + TXT_PAD             # 1408
WA_ROWS = WA_OUT0 + D                   # 1664
# packed weight-B (lane=1024) column offsets: [ w_qkv (768) | w_2 (256) ]
WB_COLS = QKV + D                       # 1024
# packed bias row column offsets
B_IMG0, B_TXT0, B_QKV0, B_2_0, B_OUT0, B_END = 0, 128, 256, 1024, 1280, 1408


def self_attention_kernel(xi_ref, xt_ref, wa_ref, wb_ref, b_ref, out_ref):
    b_img = b_ref[:, B_IMG0:B_TXT0]
    b_txt = b_ref[:, B_TXT0:B_QKV0]
    b_qkv = b_ref[:, B_QKV0:B_2_0]
    b_2 = b_ref[:, B_2_0:B_OUT0]
    b_out = b_ref[:, B_OUT0:B_END]

    # --- encoders (dropout == identity in eval mode) -----------------------
    h_img = jnp.maximum(
        jnp.dot(xi_ref[...], wa_ref[WA_IMG0:WA_TXT0, :],
                preferred_element_type=jnp.float32) + b_img, 0.0)        # (m,128)
    h_txt = jnp.maximum(
        jnp.dot(xt_ref[...], wa_ref[WA_TXT0:WA_OUT0, :],
                preferred_element_type=jnp.float32) + b_txt, 0.0)        # (m,128)

    # --- fused q/k/v projection, no concat: row-split packed weight --------
    qkv = (jnp.dot(h_img.astype(jnp.bfloat16), wb_ref[0:H, 0:QKV],
                   preferred_element_type=jnp.float32)
           + jnp.dot(h_txt.astype(jnp.bfloat16), wb_ref[H:D, 0:QKV],
                     preferred_element_type=jnp.float32)
           + b_qkv)                                                      # (m,768)
    q = qkv[:, 0 * D:1 * D]
    k = qkv[:, 1 * D:2 * D]
    v = qkv[:, 2 * D:3 * D]

    # --- attention scores + GLOBAL softmax over all m*m entries ------------
    s = lax.dot_general(q, k, (((1,), (1,)), ((), ())),
                        preferred_element_type=jnp.float32) * INV_SQRT_D
    s_max = jnp.max(jnp.max(s, axis=1, keepdims=True), axis=0, keepdims=True)
    e = jnp.exp(s - s_max)
    denom = jnp.sum(jnp.sum(e, axis=1, keepdims=True), axis=0, keepdims=True)
    a = e * pl.reciprocal(denom, approx=True)                            # (m,m)

    f = jnp.dot(a, v, preferred_element_type=jnp.float32)                # (m,256)

    # fc_1 branch of the original forward is overwritten (dead code) -> skipped.
    x2 = jnp.maximum(
        jnp.dot(f.astype(jnp.bfloat16), wb_ref[:, QKV:WB_COLS],
                preferred_element_type=jnp.float32) + b_2, 0.0)          # (m,256)

    logits = jnp.dot(x2.astype(jnp.bfloat16), wa_ref[WA_OUT0:WA_ROWS, :],
                     preferred_element_type=jnp.float32) + b_out         # (m,128)
    # padded class lanes carry a -1e30 bias -> exp == 0, log_softmax unaffected
    lmax = jnp.max(logits, axis=-1, keepdims=True)
    lse = lmax + jnp.log(jnp.sum(jnp.exp(logits - lmax), axis=-1, keepdims=True))
    out_ref[...] = logits - lse


def pack_params(p):
    """Math-layout (in_features, out_features) f32 params -> 2 packed bf16
    weight buffers + 1 f32 bias row.  NOTE: real PyTorch nn.Linear checkpoints
    store weights as (out, in) and must be transposed before packing."""
    wa = jnp.zeros((WA_ROWS, 128), jnp.float32)
    wa = wa.at[WA_IMG0:WA_IMG0 + IMG_LEN].set(p["w_img"])
    wa = wa.at[WA_TXT0:WA_TXT0 + TXT_LEN].set(p["w_txt"])          # pad rows stay 0
    wa = wa.at[WA_OUT0:WA_ROWS, :N_CLASSES].set(p["w_out"])        # pad lanes stay 0

    wqkv = jnp.concatenate([p["w_q"], p["w_k"], p["w_v"]], axis=1)  # (256, 768)
    wb = jnp.concatenate([wqkv, p["w_2"]], axis=1)                  # (256, 1024)

    b_out_pad = jnp.full((OUT_PAD,), NEG_INF, jnp.float32).at[:N_CLASSES].set(p["b_out"])
    bias = jnp.concatenate([p["b_img"], p["b_txt"],
                            p["b_q"], p["b_k"], p["b_v"],
                            p["b_2"], b_out_pad]).reshape(1, B_END)

    return {"wa": wa.astype(jnp.bfloat16),
            "wb": wb.astype(jnp.bfloat16),
            "bias": bias.astype(jnp.float32)}


def self_attention_forward(inp_img, inp_txt, packed):
    """inp_img: (n_req, m, IMG_LEN), inp_txt: (n_req, m, TXT_LEN).
    Each request keeps its own global m*m softmax (block-diagonal across the
    grid), exactly matching the PyTorch forward applied per request."""
    n_req, m, _ = inp_img.shape
    assert m % 8 == 0, "rows per request must be a multiple of 8 (sublane tile)"

    xi = inp_img.reshape(n_req * m, IMG_LEN).astype(jnp.bfloat16)
    xt = jnp.pad(inp_txt, ((0, 0), (0, 0), (0, TXT_PAD - TXT_LEN))
                 ).reshape(n_req * m, TXT_PAD).astype(jnp.bfloat16)
    wa, wb, bias = packed["wa"], packed["wb"], packed["bias"]

    # advisory cost estimate so XLA schedules the (dominant) weight fetch early
    flops_per_req = 2 * m * (IMG_LEN * H + TXT_PAD * H + D * QKV
                             + m * D + m * D + D * D + D * OUT_PAD)
    bytes_weights = wa.size * 2 + wb.size * 2 + bias.size * 4
    bytes_per_req = m * (IMG_LEN + TXT_PAD) * 2 + m * OUT_PAD * 4
    cost = pl.CostEstimate(flops=n_req * flops_per_req,
                           transcendentals=n_req * (m * m + m * OUT_PAD + m + 1),
                           bytes_accessed=bytes_weights + n_req * bytes_per_req)

    grid_spec = pltpu.PrefetchScalarGridSpec(
        num_scalar_prefetch=0,
        grid=(n_req,),
        in_specs=[
            pl.BlockSpec((m, IMG_LEN), lambda i: (i, 0)),
            pl.BlockSpec((m, TXT_PAD), lambda i: (i, 0)),
            # weights: constant block index -> DMA'd once, VMEM-resident
            pl.BlockSpec((WA_ROWS, 128), lambda i: (0, 0)),
            pl.BlockSpec((D, WB_COLS), lambda i: (0, 0)),
            pl.BlockSpec((1, B_END), lambda i: (0, 0)),
        ],
        out_specs=pl.BlockSpec((m, OUT_PAD), lambda i: (i, 0)),
    )

    out = pl.pallas_call(
        self_attention_kernel,
        out_shape=jax.ShapeDtypeStruct((n_req * m, OUT_PAD), jnp.float32),
        grid_spec=grid_spec,
        compiler_params=pltpu.CompilerParams(
            dimension_semantics=("parallel",)),   # 2x on v7x (2 TCs), no-op on v5e/v6e
        cost_estimate=cost,
    )(xi, xt, wa, wb, bias)

    return out[:, :N_CLASSES].reshape(n_req, m, N_CLASSES)


def reference_forward(inp_img, inp_txt, packed):
    """Plain-JAX reference mirroring the kernel numerics (bf16 weights/acts,
    f32 accumulation, per-request global softmax)."""
    hp = lax.Precision.HIGHEST
    wa, wb, bias = packed["wa"], packed["wb"], packed["bias"]
    w_img, w_txt, w_out = wa[:WA_TXT0], wa[WA_TXT0:WA_OUT0], wa[WA_OUT0:]
    wqkv_i, wqkv_t, w_2 = wb[:H, :QKV], wb[H:, :QKV], wb[:, QKV:]
    b_img = bias[:, B_IMG0:B_TXT0]
    b_txt = bias[:, B_TXT0:B_QKV0]
    b_qkv = bias[:, B_QKV0:B_2_0]
    b_2 = bias[:, B_2_0:B_OUT0]
    b_out = bias[:, B_OUT0:B_END]

    def one(img, txt):
        txt_p = jnp.pad(txt, ((0, 0), (0, TXT_PAD - TXT_LEN)))
        h_i = jnp.maximum(jnp.dot(img.astype(jnp.bfloat16), w_img,
                                  preferred_element_type=jnp.float32) + b_img, 0.0)
        h_t = jnp.maximum(jnp.dot(txt_p.astype(jnp.bfloat16), w_txt,
                                  preferred_element_type=jnp.float32) + b_txt, 0.0)
        qkv = (jnp.dot(h_i.astype(jnp.bfloat16), wqkv_i, preferred_element_type=jnp.float32)
               + jnp.dot(h_t.astype(jnp.bfloat16), wqkv_t, preferred_element_type=jnp.float32)
               + b_qkv)
        q, k, v = qkv[:, :D], qkv[:, D:2 * D], qkv[:, 2 * D:]
        s = lax.dot_general(q, k, (((1,), (1,)), ((), ())),
                            preferred_element_type=jnp.float32, precision=hp) * INV_SQRT_D
        a = jax.nn.softmax(s.reshape(-1)).reshape(s.shape)        # global softmax
        f = jnp.dot(a, v, preferred_element_type=jnp.float32, precision=hp)
        x2 = jnp.maximum(jnp.dot(f.astype(jnp.bfloat16), w_2,
                                 preferred_element_type=jnp.float32) + b_2, 0.0)
        logits = jnp.dot(x2.astype(jnp.bfloat16), w_out,
                         preferred_element_type=jnp.float32) + b_out
        return jax.nn.log_softmax(logits, axis=-1)[:, :N_CLASSES]

    return jax.vmap(one)(inp_img, inp_txt)


if __name__ == "__main__":
    key = jax.random.PRNGKey(0)
    ks = jax.random.split(key, 16)

    def uinit(k, shape, fan_in):
        lim = 1.0 / (fan_in ** 0.5)
        return jax.random.uniform(k, shape, jnp.float32, -lim, lim)

    params = {
        "w_img": uinit(ks[0], (IMG_LEN, 128), IMG_LEN),
        "b_img": uinit(ks[1], (128,), IMG_LEN),
        "w_txt": uinit(ks[2], (TXT_LEN, 128), TXT_LEN),
        "b_txt": uinit(ks[3], (128,), TXT_LEN),
        "w_q": uinit(ks[4], (D, D), D), "b_q": uinit(ks[5], (D,), D),
        "w_k": uinit(ks[6], (D, D), D), "b_k": uinit(ks[7], (D,), D),
        "w_v": uinit(ks[8], (D, D), D), "b_v": uinit(ks[9], (D,), D),
        "w_2": uinit(ks[10], (D, D), D), "b_2": uinit(ks[11], (D,), D),
        "w_out": uinit(ks[12], (D, N_CLASSES), D),
        "b_out": uinit(ks[13], (N_CLASSES,), D),
    }
    packed = pack_params(params)

    N_REQ = 4   # independent requests amortizing one weight fetch / dispatch
    inp_img = jax.random.normal(ks[14], (N_REQ, BATCH, IMG_LEN), jnp.float32)
    inp_txt = jax.random.normal(ks[15], (N_REQ, BATCH, TXT_LEN), jnp.float32)

    out = self_attention_forward(inp_img, inp_txt, packed)
    out = jax.block_until_ready(out)

    ref = reference_forward(inp_img, inp_txt, packed)
    assert out.shape == (N_REQ, BATCH, N_CLASSES)
    assert jnp.allclose(out, ref, rtol=2e-3, atol=2e-3), \
        float(jnp.max(jnp.abs(out - ref)))

    print("KERNEL_OK")
</pallas_src>

<mosaic_0001>
module attributes {stable_mosaic.version = 11 : i64} {
  func.func @self_attention_kernel(%arg0: i32, %arg1: memref<8x1024xbf16, #tpu.memory_space<vmem>>, %arg2: memref<8x384xbf16, #tpu.memory_space<vmem>>, %arg3: memref<1664x128xbf16, #tpu.memory_space<vmem>>, %arg4: memref<256x1024xbf16, #tpu.memory_space<vmem>>, %arg5: memref<1x1408xf32, #tpu.memory_space<vmem>>, %arg6: memref<8x128xf32, #tpu.memory_space<vmem>>) attributes {dimension_semantics = [#tpu.dimension_semantics<parallel>], iteration_bounds = array<i64: 4>, scalar_prefetch = 0 : i64, scratch_operands = 0 : i64, tpu.core_type = #tpu.core_type<tc>, window_params = [{transform_indices = @transform_0, window_bounds = array<i64: 8, 1024>}, {transform_indices = @transform_1, window_bounds = array<i64: 8, 384>}, {pipeline_mode = #tpu.pipeline_mode<synchronous>, transform_indices = @transform_2, window_bounds = array<i64: 1664, 128>}, {pipeline_mode = #tpu.pipeline_mode<synchronous>, transform_indices = @transform_3, window_bounds = array<i64: 256, 1024>}, {pipeline_mode = #tpu.pipeline_mode<synchronous>, transform_indices = @transform_4, window_bounds = array<i64: 1, 1408>}, {transform_indices = @transform_5, window_bounds = array<i64: 8, 128>}]} {
    %c0 = arith.constant 0 : index
    %c0_0 = arith.constant 0 : index
    %0 = vector.load %arg5[%c0, %c0_0] : memref<1x1408xf32, #tpu.memory_space<vmem>>, vector<1x128xf32>
    %c0_1 = arith.constant 0 : index
    %c128 = arith.constant 128 : index
    %1 = vector.load %arg5[%c0_1, %c128] : memref<1x1408xf32, #tpu.memory_space<vmem>>, vector<1x128xf32>
    %c0_2 = arith.constant 0 : index
    %c256 = arith.constant 256 : index
    %2 = vector.load %arg5[%c0_2, %c256] : memref<1x1408xf32, #tpu.memory_space<vmem>>, vector<1x768xf32>
    %c0_3 = arith.constant 0 : index
    %c1024 = arith.constant 1024 : index
    %3 = vector.load %arg5[%c0_3, %c1024] : memref<1x1408xf32, #tpu.memory_space<vmem>>, vector<1x256xf32>
    %c0_4 = arith.constant 0 : index
    %c1280 = arith.constant 1280 : index
    %4 = vector.load %arg5[%c0_4, %c1280] : memref<1x1408xf32, #tpu.memory_space<vmem>>, vector<1x128xf32>
    %c0_5 = arith.constant 0 : index
    %c0_6 = arith.constant 0 : index
    %5 = vector.load %arg1[%c0_5, %c0_6] : memref<8x1024xbf16, #tpu.memory_space<vmem>>, vector<8x1024xbf16>
    %c0_7 = arith.constant 0 : index
    %c0_8 = arith.constant 0 : index
    %6 = vector.load %arg3[%c0_7, %c0_8] : memref<1664x128xbf16, #tpu.memory_space<vmem>>, vector<1024x128xbf16>
    %cst = arith.constant dense<0.000000e+00> : vector<8x128xf32>
    %7 = tpu.matmul %5, %6, %cst {dimension_numbers = #tpu.dot_dimension_numbers<[1], [0], [0], [1], [0, 0, 1, 1], [], []>} : vector<8x1024xbf16>, vector<1024x128xbf16>, vector<8x128xf32> -> vector<8x128xf32>
    %8 = vector.broadcast %0 : vector<1x128xf32> to vector<8x128xf32>
    %9 = arith.addf %7, %8 : vector<8x128xf32>
    %cst_9 = arith.constant 0.000000e+00 : f32
    %10 = vector.broadcast %cst_9 : f32 to vector<8x128xf32>
    %11 = arith.maximumf %9, %10 : vector<8x128xf32>
    %c0_10 = arith.constant 0 : index
    %c0_11 = arith.constant 0 : index
    %12 = vector.load %arg2[%c0_10, %c0_11] : memref<8x384xbf16, #tpu.memory_space<vmem>>, vector<8x384xbf16>
    %c1024_12 = arith.constant 1024 : index
    %c0_13 = arith.constant 0 : index
    %13 = vector.load %arg3[%c1024_12, %c0_13] : memref<1664x128xbf16, #tpu.memory_space<vmem>>, vector<384x128xbf16>
    %cst_14 = arith.constant dense<0.000000e+00> : vector<8x128xf32>
    %14 = tpu.matmul %12, %13, %cst_14 {dimension_numbers = #tpu.dot_dimension_numbers<[1], [0], [0], [1], [0, 0, 1, 1], [], []>} : vector<8x384xbf16>, vector<384x128xbf16>, vector<8x128xf32> -> vector<8x128xf32>
    %15 = vector.broadcast %1 : vector<1x128xf32> to vector<8x128xf32>
    %16 = arith.addf %14, %15 : vector<8x128xf32>
    %cst_15 = arith.constant 0.000000e+00 : f32
    %17 = vector.broadcast %cst_15 : f32 to vector<8x128xf32>
    %18 = arith.maximumf %16, %17 : vector<8x128xf32>
    %19 = arith.truncf %11 : vector<8x128xf32> to vector<8x128xbf16>
    %c0_16 = arith.constant 0 : index
    %c0_17 = arith.constant 0 : index
    %20 = vector.load %arg4[%c0_16, %c0_17] : memref<256x1024xbf16, #tpu.memory_space<vmem>>, vector<128x768xbf16>
    %cst_18 = arith.constant dense<0.000000e+00> : vector<8x768xf32>
    %21 = tpu.matmul %19, %20, %cst_18 {dimension_numbers = #tpu.dot_dimension_numbers<[1], [0], [0], [1], [0, 0, 1, 1], [], []>} : vector<8x128xbf16>, vector<128x768xbf16>, vector<8x768xf32> -> vector<8x768xf32>
    %22 = arith.truncf %18 : vector<8x128xf32> to vector<8x128xbf16>
    %c128_19 = arith.constant 128 : index
    %c0_20 = arith.constant 0 : index
    %23 = vector.load %arg4[%c128_19, %c0_20] : memref<256x1024xbf16, #tpu.memory_space<vmem>>, vector<128x768xbf16>
    %cst_21 = arith.constant dense<0.000000e+00> : vector<8x768xf32>
    %24 = tpu.matmul %22, %23, %cst_21 {dimension_numbers = #tpu.dot_dimension_numbers<[1], [0], [0], [1], [0, 0, 1, 1], [], []>} : vector<8x128xbf16>, vector<128x768xbf16>, vector<8x768xf32> -> vector<8x768xf32>
    %25 = arith.addf %21, %24 : vector<8x768xf32>
    %26 = vector.broadcast %2 : vector<1x768xf32> to vector<8x768xf32>
    %27 = arith.addf %25, %26 : vector<8x768xf32>
    %28 = vector.extract_strided_slice %27 {offsets = [0, 0], sizes = [8, 256], strides = [1, 1]} : vector<8x768xf32> to vector<8x256xf32>
    %29 = vector.extract_strided_slice %27 {offsets = [0, 256], sizes = [8, 256], strides = [1, 1]} : vector<8x768xf32> to vector<8x256xf32>
    %30 = vector.extract_strided_slice %27 {offsets = [0, 512], sizes = [8, 256], strides = [1, 1]} : vector<8x768xf32> to vector<8x256xf32>
    %cst_22 = arith.constant dense<0.000000e+00> : vector<8x8xf32>
    %31 = tpu.matmul %28, %29, %cst_22 {dimension_numbers = #tpu.dot_dimension_numbers<[1], [1], [0], [0], [0, 0, 1, 0], [], []>} : vector<8x256xf32>, vector<8x256xf32>, vector<8x8xf32> -> vector<8x8xf32>
    %cst_23 = arith.constant 6.250000e-02 : f32
    %32 = vector.broadcast %cst_23 : f32 to vector<8x8xf32>
    %33 = arith.mulf %31, %32 : vector<8x8xf32>
    %cst_24 = arith.constant dense<0xFF800000> : vector<8xf32>
    %34 = vector.multi_reduction <maximumf>, %33, %cst_24 [1] : vector<8x8xf32> to vector<8xf32>
    %35 = vector.shape_cast %34 : vector<8xf32> to vector<8x1xf32>
    %cst_25 = arith.constant dense<0xFF800000> : vector<1xf32>
    %36 = vector.multi_reduction <maximumf>, %35, %cst_25 [0] : vector<8x1xf32> to vector<1xf32>
    %37 = vector.shape_cast %36 : vector<1xf32> to vector<1x1xf32>
    %38 = vector.broadcast %37 : vector<1x1xf32> to vector<8x8xf32>
    %39 = arith.subf %33, %38 : vector<8x8xf32>
    %40 = math.exp %39 : vector<8x8xf32>
    %cst_26 = arith.constant dense<0.000000e+00> : vector<8xf32>
    %41 = vector.multi_reduction <add>, %40, %cst_26 [1] : vector<8x8xf32> to vector<8xf32>
    %42 = vector.shape_cast %41 : vector<8xf32> to vector<8x1xf32>
    %cst_27 = arith.constant dense<0.000000e+00> : vector<1xf32>
    %43 = vector.multi_reduction <add>, %42, %cst_27 [0] : vector<8x1xf32> to vector<1xf32>
    %44 = vector.shape_cast %43 : vector<1xf32> to vector<1x1xf32>
    %45 = tpu.reciprocal %44 {approx = true} : vector<1x1xf32> -> vector<1x1xf32>
    %46 = vector.broadcast %45 : vector<1x1xf32> to vector<8x8xf32>
    %47 = arith.mulf %40, %46 : vector<8x8xf32>
    %cst_28 = arith.constant dense<0.000000e+00> : vector<8x256xf32>
    %48 = tpu.matmul %47, %30, %cst_28 {dimension_numbers = #tpu.dot_dimension_numbers<[1], [0], [0], [1], [0, 0, 1, 1], [], []>} : vector<8x8xf32>, vector<8x256xf32>, vector<8x256xf32> -> vector<8x256xf32>
    %49 = arith.truncf %48 : vector<8x256xf32> to vector<8x256xbf16>
    %c0_29 = arith.constant 0 : index
    %c768 = arith.constant 768 : index
    %50 = vector.load %arg4[%c0_29, %c768] : memref<256x1024xbf16, #tpu.memory_space<vmem>>, vector<256x256xbf16>
    %cst_30 = arith.constant dense<0.000000e+00> : vector<8x256xf32>
    %51 = tpu.matmul %49, %50, %cst_30 {dimension_numbers = #tpu.dot_dimension_numbers<[1], [0], [0], [1], [0, 0, 1, 1], [], []>} : vector<8x256xbf16>, vector<256x256xbf16>, vector<8x256xf32> -> vector<8x256xf32>
    %52 = vector.broadcast %3 : vector<1x256xf32> to vector<8x256xf32>
    %53 = arith.addf %51, %52 : vector<8x256xf32>
    %cst_31 = arith.constant 0.000000e+00 : f32
    %54 = vector.broadcast %cst_31 : f32 to vector<8x256xf32>
    %55 = arith.maximumf %53, %54 : vector<8x256xf32>
    %56 = arith.truncf %55 : vector<8x256xf32> to vector<8x256xbf16>
    %c1408 = arith.constant 1408 : index
    %c0_32 = arith.constant 0 : index
    %57 = vector.load %arg3[%c1408, %c0_32] : memref<1664x128xbf16, #tpu.memory_space<vmem>>, vector<256x128xbf16>
    %cst_33 = arith.constant dense<0.000000e+00> : vector<8x128xf32>
    %58 = tpu.matmul %56, %57, %cst_33 {dimension_numbers = #tpu.dot_dimension_numbers<[1], [0], [0], [1], [0, 0, 1, 1], [], []>} : vector<8x256xbf16>, vector<256x128xbf16>, vector<8x128xf32> -> vector<8x128xf32>
    %59 = vector.broadcast %4 : vector<1x128xf32> to vector<8x128xf32>
    %60 = arith.addf %58, %59 : vector<8x128xf32>
    %cst_34 = arith.constant dense<0xFF800000> : vector<8xf32>
    %61 = vector.multi_reduction <maximumf>, %60, %cst_34 [1] : vector<8x128xf32> to vector<8xf32>
    %62 = vector.shape_cast %61 : vector<8xf32> to vector<8x1xf32>
    %63 = vector.broadcast %62 : vector<8x1xf32> to vector<8x128xf32>
    %64 = arith.subf %60, %63 : vector<8x128xf32>
    %65 = math.exp %64 : vector<8x128xf32>
    %cst_35 = arith.constant dense<0.000000e+00> : vector<8xf32>
    %66 = vector.multi_reduction <add>, %65, %cst_35 [1] : vector<8x128xf32> to vector<8xf32>
    %67 = vector.shape_cast %66 : vector<8xf32> to vector<8x1xf32>
    %68 = math.log %67 : vector<8x1xf32>
    %69 = arith.addf %62, %68 : vector<8x1xf32>
    %70 = vector.broadcast %69 : vector<8x1xf32> to vector<8x128xf32>
    %71 = arith.subf %60, %70 : vector<8x128xf32>
    %c0_36 = arith.constant 0 : index
    %c0_37 = arith.constant 0 : index
    %72 = vector.load %arg6[%c0_36, %c0_37] : memref<8x128xf32, #tpu.memory_space<vmem>>, vector<8x128xf32>
    tpu.vector_store %arg6[%c0_36, %c0_37], %71 {strides = array<i32>} : memref<8x128xf32, #tpu.memory_space<vmem>>, vector<8x128xf32>,
    return
  }
  func.func @transform_0(%arg0: i32) -> (i32, i32) {
    %c0_i32 = arith.constant 0 : i32
    %c0_i32_0 = arith.constant 0 : i32
    return %arg0, %c0_i32 : i32, i32
  }
  func.func @transform_1(%arg0: i32) -> (i32, i32) {
    %c0_i32 = arith.constant 0 : i32
    %c0_i32_0 = arith.constant 0 : i32
    return %arg0, %c0_i32 : i32, i32
  }
  func.func @transform_2(%arg0: i32) -> (i32, i32) {
    %c0_i32 = arith.constant 0 : i32
    %c0_i32_0 = arith.constant 0 : i32
    %c0_i32_1 = arith.constant 0 : i32
    return %c0_i32, %c0_i32_0 : i32, i32
  }
  func.func @transform_3(%arg0: i32) -> (i32, i32) {
    %c0_i32 = arith.constant 0 : i32
    %c0_i32_0 = arith.constant 0 : i32
    %c0_i32_1 = arith.constant 0 : i32
    return %c0_i32, %c0_i32_0 : i32, i32
  }
  func.func @transform_4(%arg0: i32) -> (i32, i32) {
    %c0_i32 = arith.constant 0 : i32
    %c0_i32_0 = arith.constant 0 : i32
    %c0_i32_1 = arith.constant 0 : i32
    return %c0_i32, %c0_i32_0 : i32, i32
  }
  func.func @transform_5(%arg0: i32) -> (i32, i32) {
    %c0_i32 = arith.constant 0 : i32
    %c0_i32_0 = arith.constant 0 : i32
    return %arg0, %c0_i32 : i32, i32
  }
}

</mosaic_0001>

<bundles_post_ra>
// kernel: tpu_custom_call.1
= control target key start
LH: loop header
LB: loop body
LE: loop exit
PB: predicated region body
PF: predicated region fallthrough
CT: control target
= control target key end

     0   :  { %s4134_s0 = inlined_call_operand.hbm [shape: bf16[32,1024], index: 0, kind: input, shape index: {}]   ;;  %s4135_s1 = inlined_call_operand.hbm [shape: bf16[32,384], index: 1, kind: input, shape index: {}]   ;;  %s4136_s2 = inlined_call_operand.hbm [shape: bf16[1664,128], index: 2, kind: input, shape index: {}]   ;;  %s4137_s3 = inlined_call_operand.hbm [shape: bf16[256,1024], index: 3, kind: input, shape index: {}]   ;;  %s4138_s4 = inlined_call_operand.vmem [shape: f32[1,1408], index: 4, kind: input, shape index: {}]   ;;  %s4139_s5 = inlined_call_operand.hbm [shape: f32[32,128], index: 5, kind: output, shape index: {}]  }
   0x1   :  { %4144 = sst [smem:[#allocation16_spill]] %s4134_s0 }
   0x2   :  { %10 = vsyncpa [#allocation3], 0 }
   0x3   :  { %12 = vsyncpa [#allocation3 + $0x1], 0 }
   0x4   :  { %13 = vsyncpa [#allocation6], 0 }
   0x5   :  { %15 = vsyncpa [#allocation6 + $0x1], 0 }
   0x6   :  { %16 = vsyncpa [#allocation9], 0 }
   0x7   :  { %17 = vsyncpa [#allocation4], 0 }
   0x8   :  { %19 = vsyncpa [#allocation4 + $0x1], 0  ;;  %s3779_s18 = smov 0   ;;  %s3781_s19 = smov 0  }
   0x9   :  { %s3783_s20 = smov 0   ;;  %s3785_s21 = smov 0  }
   0xa LB: > { %s3800_s22 = sadd.s32 4294967295, %s3735_s21   ;;  %s2909_s23 = sadd.s32 4294967294, %s3735_s21   ;;  %s3735_s21 = sphi %s3785_s21, %s4165_s21   ;;  %s3731_s20 = sphi %s3783_s20, %s4164_s20   ;;  %s3727_s19 = sphi %s3781_s19, %s4163_s19   ;;  %s3723_s18 = sphi %s3779_s18, %s4162_s18  }
   0xb   : > { %p45_p0 = scmp.ne.s32.totalorder %s3727_s19, %s3723_s18  ;;  %p4140_p1 = scmp.eq.s32.totalorder %s3800_s22, 0 }
   0xc   : > { %p164_p3 = scmp.eq.s32.totalorder %s2909_s23, 3  ;;  %p2910_p5 = scmp.ge.s32.totalorder %s3735_s21, 1 }
   0xd   : > { %p3809_p4 = por %p4140_p1, %p45_p0  ;;  %p171_p7 = scmp.lt.s32.totalorder %s3735_s21, 5 }
   0xe   : > { %p3814_p6 = por %p164_p3, %p45_p0  ;;  %s3737_s27 = smov [#allocation7]  }
   0xf   : > { %s4145_s24 = scalar_select %p3809_p4, 1, 0 }
  0x10   : > { %s4146_s25 = scalar_select %p3814_p6, 1, 0 }
  0x11   : > { %p3819_p8 = pnand %p2910_p5, %p171_p7  ;;  %s183_s28 = sshll.u32 %s3737_s27, 4  ;;  %s184_s28 = int_to_ptr.vmem [resolvable:$true] %s183_s28 }
  0x12   : > { %s3738_s30 = smov [#allocation8]   ;;  %s3541_s9 = scalar_lea.hbm %s4136_s2, 13312 }
  0x13   : > { %s4147_s26 = scalar_select %p3819_p8, 1, 0 }
  0x14   : > { %p3353_p9 = pneg %p3819_p8  ;;  %s196_s6 = sshll.u32 %s3738_s30, 4  ;;  %s3831_s6 = int_to_ptr.vmem [resolvable:$true] %s196_s6 }
  0x15   : > { %p3542_p11 = scmp.ne.s32.totalorder %s4136_s2, %s3541_s9  ;;  %p3548_p3 = scmp.lt.u32.totalorder %s3541_s9, %s4136_s2 }
  0x16   : > { %p3827_p10 = pnand %p3353_p9, %p4140_p1 }
  0x18   : > { %p3543_p12 = pneg %p3827_p10 }
  0x1a   : > { %p3544_p13 = pnand %p3543_p12, %p3542_p11 }
  0x1c   : > { %p3545_p0 = pneg %p3544_p13 }
  0x1e   : > { %p3550_p5 = pnand %p3548_p3, %p3545_p0 }
  0x20   : > { %3553 = shalt.err (!%p3550_p5)
}
  0x21   : > { %s3554_s14 = scalar_lea.vmem %s184_s28, 13312  ;;  %p3562_p2 = scmp.lt.s32.totalorder %s184_s28, %s184_s28 }
  0x22   : > { %p3555_p7 = scmp.ne.s32.totalorder %s184_s28, %s3554_s14  ;;  %p3563_p6 = scmp.lt.s32.totalorder %s3554_s14, %s3554_s14 }
  0x24   : > { %p3557_p9 = pnand %p3555_p7, %p3543_p12  ;;  %p3564_p4 = por %p3563_p6, %p3562_p2 }
  0x26   : > { %p3558_p1 = pneg %p3557_p9 }
  0x28   : > { %p3565_p8 = pnand %p3564_p4, %p3558_p1 }
  0x2a   : > { %3568 = shalt.err (!%p3565_p8)
}
  0x2b   : > { %s3739_s15 = smov 64   ;;  %s3740_s16 = smov 4  }
  0x2c   : > { %3356 = dma.hbm_to_vmem [thread:$0]  (!%p3827_p10), %s4136_s2, 13312, %s184_s28, [#allocation6], %s3739_s15, %s3739_s15, %s3740_s16  }
  0x2d   : > { %s3569_s7 = scalar_lea.hbm %s4137_s3, 16384 }
  0x2e   : > { %p3570_p11 = scmp.ne.s32.totalorder %s4137_s3, %s3569_s7  ;;  %p3576_p4 = scmp.lt.u32.totalorder %s3569_s7, %s4137_s3 }
  0x30   : > { %p3572_p1 = pnand %p3570_p11, %p3543_p12 }
  0x32   : > { %p3573_p2 = pneg %p3572_p1 }
  0x34   : > { %p3578_p6 = pnand %p3576_p4, %p3573_p2 }
  0x36   : > { %3581 = shalt.err (!%p3578_p6)
}
  0x37   : > { %s3582_s28 = scalar_lea.vmem %s3831_s6, 16384  ;;  %p3590_p3 = scmp.lt.s32.totalorder %s3831_s6, %s3831_s6 }
  0x38   : > { %p3583_p8 = scmp.ne.s32.totalorder %s3831_s6, %s3582_s28  ;;  %p3591_p5 = scmp.lt.s32.totalorder %s3582_s28, %s3582_s28 }
  0x3a   : > { %p3585_p13 = pnand %p3583_p8, %p3543_p12  ;;  %p3592_p7 = por %p3591_p5, %p3590_p3 }
  0x3c   : > { %p3586_p0 = pneg %p3585_p13 }
  0x3e   : > { %p3593_p9 = pnand %p3592_p7, %p3586_p0 }
  0x40   : > { %3596 = shalt.err (!%p3593_p9)
}
  0x41   : > { %s3741_s12 = smov 512   ;;  %s3742_s13 = smov 32  }
  0x42   : > { %3359 = dma.hbm_to_vmem [thread:$0]  (!%p3827_p10), %s4137_s3, 16384, %s3831_s6, [#allocation9], %s3741_s12, %s3741_s12, %s3742_s13  }
  0x43   : > { %s3881_s16 = sadd.s32 1, %s3735_s21   ;;  %s32_s23 = sadd.s32 1, %s3731_s20 }
  0x44   : > { %s29_s17 = ssub.s32 %s3735_s21, %s3881_s16  ;;  %p39_p11 = scmp.ne.s32.totalorder %s3731_s20, %s3727_s19 }
  0x45   : > { %p30_p12 = scmp.eq.s32.totalorder %s29_s17, 0  ;;  %p40_p1 = scmp.eq.s32.totalorder %s3735_s21, 0 }
  0x46   : > { %p4149_p4 = scmp.eq.s32.totalorder %s3800_s22, 3  ;;  %p3373_p8 = scmp.lt.s32.totalorder %s3735_s21, 4 }
  0x47   : > { %s3890_s27 = scalar_select %p30_p12, %s3731_s20, %s32_s23  }
  0x48   : > { %p41_p2 = por %p40_p1, %p39_p11  ;;  %p3894_p6 = por %p4149_p4, %p39_p11 }
  0x49   : > { %s3900_s29 = sand.u32 1, %s3731_s20   ;;  %s3174_s7 = sshll.u32 %s3735_s21, 9 }
  0x4a   : > { %s4150_s30 = scalar_select %p3894_p6, 1, 0 }
  0x4b   : > { %s2914_s6 = sshll.u32 %s3900_s29, 5  ;;  %s4151_s0 = sld [smem:[#allocation16_spill]] }
  0x4c   : > { %s217_s11 = scalar_lea.vmem [#allocation2], %s2914_s6  ;;  %p3911_p10 = pnand %p3373_p8, %p41_p2 }
  0x4d   : > { %s225_s28 = sshll.u32 %s217_s11, 4  ;;  %s3336_s14 = smul.u32 12, %s3900_s29  ;;  %s3909_s28 = int_to_ptr.vmem [resolvable:$true] %s225_s28 }
  0x4e   : > { %s214_s15 = scalar_lea.sflag [#allocation3], %s3900_s29  ;;  %p3599_p0 = pneg %p3911_p10 }
  0x51   : > { %s3907_s10 = scalar_lea.hbm %s4151_s0, %s3174_s7  ;;  %s3602_s7 = scalar_lea.hbm %s4151_s0, 2048 }
  0x52   : > { %s3597_s17 = scalar_lea.hbm %s3907_s10, 512  ;;  %p3603_p7 = scmp.lt.u32.totalorder %s3907_s10, %s4151_s0 }
  0x53   : > { %p3598_p13 = scmp.ne.s32.totalorder %s3907_s10, %s3597_s17  ;;  %p3604_p9 = scmp.lt.u32.totalorder %s3602_s7, %s3597_s17 }
  0x54   : > { %p3606_p11 = scmp.lt.u32.totalorder %s3597_s17, %s3907_s10 }
  0x55   : > { %p3600_p3 = pnand %p3599_p0, %p3598_p13  ;;  %p3605_p12 = por %p3604_p9, %p3603_p7 }
  0x57   : > { %p3601_p5 = pneg %p3600_p3  ;;  %p3607_p1 = por %p3606_p11, %p3605_p12 }
  0x59   : > { %p3608_p2 = pnand %p3607_p1, %p3601_p5 }
  0x5b   : > { %3611 = shalt.err (!%p3608_p2)
}
  0x5c   : > { %s3612_s11 = scalar_lea.vmem %s3909_s28, 512  ;;  %s3743_s23 = smov [#allocation2]  }
  0x5d   : > { %p3613_p4 = scmp.ne.s32.totalorder %s3909_s28, %s3612_s11  ;;  %s3617_s6 = sshll.u32 %s3743_s23, 4  ;;  %s3618_s6 = int_to_ptr.vmem [resolvable:$false] %s3617_s6 }
  0x5e   : > { %s3619_s8 = scalar_lea.vmem %s3618_s6, 1024  ;;  %p3620_p3 = scmp.lt.s32.totalorder %s3909_s28, %s3618_s6 }
  0x5f   : > { %p3615_p8 = pnand %p3613_p4, %p3599_p0  ;;  %p3621_p7 = scmp.lt.s32.totalorder %s3619_s8, %s3612_s11 }
  0x61   : > { %p3616_p13 = pneg %p3615_p8  ;;  %p3622_p9 = por %p3621_p7, %p3620_p3 }
  0x63   : > { %p3623_p12 = pnand %p3622_p9, %p3616_p13 }
  0x65   : > { %3626 = shalt.err (!%p3623_p12)
}
  0x66   : > { %3363 = dma.hbm_to_vmem [thread:$0]  (!%p3911_p10), %s3907_s10, 512, %s3909_s28, %s214_s15  }
  0x67   : > { %s3337_s17 = smul.u32 192, %s3735_s21  ;;  %s236_s7 = scalar_lea.vmem [#allocation5], %s3336_s14 }
  0x68   : > { %s244_s9 = sshll.u32 %s236_s7, 4  ;;  %s4153_s6 = sand.u32 1, %s3735_s21   ;;  %s245_s9 = int_to_ptr.vmem [resolvable:$true] %s244_s9 }
  0x69   : > { %s3949_s11 = scalar_lea.hbm %s4135_s1, %s3337_s17  ;;  %s233_s8 = scalar_lea.sflag [#allocation6], %s4153_s6 }
  0x6a   : > { %s3627_s0 = scalar_lea.hbm %s3949_s11, 192  ;;  %s3632_s28 = scalar_lea.hbm %s4135_s1, 768 }
  0x6b   : > { %p3628_p5 = scmp.ne.s32.totalorder %s3949_s11, %s3627_s0  ;;  %p3633_p2 = scmp.lt.u32.totalorder %s3949_s11, %s4135_s1 }
  0x6c   : > { %p3634_p4 = scmp.lt.u32.totalorder %s3632_s28, %s3627_s0  ;;  %p3636_p13 = scmp.lt.u32.totalorder %s3627_s0, %s3949_s11 }
  0x6d   : > { %p3630_p11 = pnand %p3628_p5, %p3599_p0 }
  0x6e   : > { %p3635_p8 = por %p3634_p4, %p3633_p2 }
  0x6f   : > { %p3631_p1 = pneg %p3630_p11 }
  0x70   : > { %p3637_p3 = por %p3636_p13, %p3635_p8 }
  0x72   : > { %p3638_p7 = pnand %p3637_p3, %p3631_p1 }
  0x74   : > { %3641 = shalt.err (!%p3638_p7)
}
  0x75   : > { %s3642_s15 = scalar_lea.vmem %s245_s9, 192  ;;  %s3744_s17 = smov [#allocation5]  }
  0x76   : > { %p3643_p9 = scmp.ne.s32.totalorder %s245_s9, %s3642_s15  ;;  %s3647_s7 = sshll.u32 %s3744_s17, 4  ;;  %s3648_s7 = int_to_ptr.vmem [resolvable:$false] %s3647_s7 }
  0x77   : > { %s3649_s23 = scalar_lea.vmem %s3648_s7, 384  ;;  %p3650_p11 = scmp.lt.s32.totalorder %s245_s9, %s3648_s7 }
  0x78   : > { %p3645_p12 = pnand %p3643_p9, %p3599_p0  ;;  %p3651_p6 = scmp.lt.s32.totalorder %s3649_s23, %s3642_s15 }
  0x7a   : > { %p3646_p5 = pneg %p3645_p12  ;;  %p3652_p2 = por %p3651_p6, %p3650_p11 }
  0x7c   : > { %p3653_p4 = pnand %p3652_p2, %p3646_p5 }
  0x7e   : > { %3656 = shalt.err (!%p3653_p4)
}
  0x7f   : > { %3366 = dma.hbm_to_vmem [thread:$0]  (!%p3911_p10), %s3949_s11, 192, %s245_s9, %s233_s8  }
  0x80   : > { %p4154_p1 = scmp.ne.s32.totalorder %s4147_s26, 0 }
  0x81   : > { %s3975_s0 = sand.u32 (!%p4154_p1), 1, %s3727_s19   ;;  %p4155_p6 = scmp.ne.s32.totalorder (!%p4154_p1), %s4145_s24, 0 }
  0x82   : > { %253 = sbr.rel (%p4154_p1) target bundleno = 2289 (0x8f1), region = 40  ;;  %s2919_s6 = sshll.u32 (!%p4154_p1), %s3975_s0, 5 }
  0x83   : > { %s256_s29 = scalar_lea.sflag (!%p4154_p1), [#allocation3], %s3975_s0  ;;  %s3979_s10 = scalar_lea.vmem (!%p4154_p1), [#allocation2], %s2919_s6 }
  0x89   : > { %3702 = dma.done.wait (%p4155_p6), %s256_s29, 512  }
  0x8a   : > { %3704 = vsyncadd (%p4155_p6), %s256_s29, 4294966784  ;;  %s264_s26 = sand.u32 1, %s3800_s22   ;;  %s3338_s12 = smul.u32 12, %s3975_s0 }
  0x8b   : > { %s265_s9 = scalar_lea.sflag [#allocation6], %s264_s26 }
  0x8c   : > { %s3987_s11 = scalar_lea.vmem [#allocation5], %s3338_s12 }
  0x8d   : > { %3706 = dma.done.wait (%p4155_p6), %s265_s9, 192  }
  0x8e   : > { %3708 = vsyncadd (%p4155_p6), %s265_s9, 4294967104  ;;  %p4156_p10 = scmp.eq.s32.totalorder %s3800_s22, 0 }
  0x90   : > { %3710 = dma.done.wait (%p4156_p10), [#allocation6], 13312   ;;  %p4157_p0 = pmov %p4156_p10 }
  0x92   : > { %3712 = vsyncadd (%p4157_p0), [#allocation6], 4294953984  ;;  %p4158_p8 = pmov %p4157_p0 }
  0x93   : > { %p4159_p13 = pmov %p4157_p0 }
  0x94   : > { %3714 = dma.done.wait (%p4158_p8), [#allocation9], 16384  }
  0x95   : > { %3716 = vsyncadd (%p4159_p13), [#allocation9], 4294950912  ;;  %v3418_v0 = vld [vmem:[#allocation7 + $0x40] sm:$0xff]   ;;  %v3422_v4 = vld [vmem:[#allocation7 + $0x48] sm:$0xff]   ;;  %vm3746_vm0 = vmmov 0   ;;  %vm2249_vm1 = vcmask 64512  }
  0x96   : > { %v3419_v1 = vld [vmem:[#allocation7] sm:$0xff]   ;;  %3175 = vmatprep.subr.bf16.mxu0 %v3418_v0  ;;  %v3423_v5 = vld [vmem:[#allocation7 + $0x8] sm:$0xff]   ;;  %v3426_v8 = vld [vmem:[#allocation7 + $0x50] sm:$0xff]   ;;  %s2922_s29 = sshll.u32 %s3975_s0, 3  ;;  %s2784_s8 = scalar_lea.sflag [#allocation4], %s3975_s0 }
  0x97   : > { %v3420_v2 = vld [vmem:[#allocation7 + $0xc0] sm:$0xff]   ;;  %3176 = vmatpush3.bf16.msra.mxu0 %v3419_v1  ;;  %v3424_v6 = vld [vmem:[#allocation7 + $0xc8] sm:$0xff]   ;;  %v3427_v9 = vld [vmem:[#allocation7 + $0x10] sm:$0xff]   ;;  %s307_s26 = scalar_lea.vmem [#allocation10], %s2922_s29  ;;  %p4160_p7 = scmp.ne.s32.totalorder %s4150_s30, 0 }
  0x98   : > { %v3421_v3 = vld [vmem:[#allocation7 + $0x80] sm:$0xff]   ;;  %3197 = vmatprep.subr.bf16.mxu1 %v3420_v2  ;;  %3177 = vmatprep.subr.bf16.mxu0 %v3422_v4  ;;  %v3425_v7 = vld [vmem:[#allocation7 + $0x88] sm:$0xff]   ;;  %v3428_v10 = vld [vmem:[#allocation7 + $0xd0] sm:$0xff]   ;;  %s2797_s12 = sshll.u32 %s307_s26, 4  ;;  %s4093_s12 = int_to_ptr.vmem [resolvable:$true] %s2797_s12 }
  0x99   : > { %3198 = vmatpush3.bf16.msra.mxu1 %v3421_v3  ;;  %v3429_v11 = vld [vmem:[#allocation7 + $0x90] sm:$0xff]   ;;  %v3430_v12 = vld [vmem:[#allocation7 + $0x58] sm:$0xff]   ;;  %v3434_v16 = vld [vmem:[#allocation7 + $0x60] sm:$0xff]   ;;  %s3657_s28 = scalar_lea.vmem %s4093_s12, 128 }
  0x9a   : > { %3199 = vmatprep.subr.bf16.mxu1 %v3424_v6  ;;  %v3431_v13 = vld [vmem:[#allocation7 + $0x18] sm:$0xff]   ;;  %v3435_v17 = vld [vmem:[#allocation7 + $0x20] sm:$0xff]   ;;  %v3438_v20 = vld [vmem:[#allocation7 + $0x68] sm:$0xff]   ;;  %p3658_p3 = scmp.ne.s32.totalorder %s4093_s12, %s3657_s28 }
  0x9b   : > { %3178 = vmatpush3.bf16.msra.mxu0 %v3423_v5  ;;  %v3432_v14 = vld [vmem:[#allocation7 + $0xd8] sm:$0xff]   ;;  %v3436_v18 = vld [vmem:[#allocation7 + $0xe0] sm:$0xff]   ;;  %v3439_v21 = vld [vmem:[#allocation7 + $0x28] sm:$0xff]  }
  0x9c   : > { %3179 = vmatprep.subr.bf16.mxu0 %v3426_v8  ;;  %v3433_v15 = vld [vmem:[#allocation7 + $0x98] sm:$0xff]   ;;  %v3437_v19 = vld [vmem:[#allocation7 + $0xa0] sm:$0xff]   ;;  %v3440_v22 = vld [vmem:[#allocation7 + $0xe8] sm:$0xff]   ;;  %p3659_p9 = pnand %p3658_p3, %p4160_p7 }
  0x9d   : > { %3200 = vmatpush3.bf16.msra.mxu1 %v3425_v7  ;;  %v3441_v23 = vld [vmem:[#allocation7 + $0xa8] sm:$0xff]   ;;  %v3442_v24 = vld [vmem:[#allocation7 + $0x70] sm:$0xff]   ;;  %v3446_v28 = vld [vmem:[#allocation7 + $0x78] sm:$0xff]  }
  0x9e   : > { %3201 = vmatprep.subr.bf16.mxu1 %v3428_v10  ;;  %v3443_v25 = vld [vmem:[#allocation7 + $0x30] sm:$0xff]   ;;  %v3447_v29 = vld [vmem:[#allocation7 + $0x38] sm:$0xff]   ;;  %v314_v31 = vld [vmem:[%s3979_s10] sm:$0xff]  ;;  %p3660_p12 = pneg %p3659_p9 }
  0x9f   : > { %3180 = vmatpush3.bf16.msra.mxu0 %v3427_v9  ;;  %v3444_v26 = vld [vmem:[#allocation7 + $0xf0] sm:$0xff]   ;;  %v3448_v30 = vld [vmem:[#allocation7 + $0xf8] sm:$0xff]   ;;  %v2924_v32 = vcombine.low %v314_v31, %v314_v31  ;;  %v2925_v33 = vcombine.high %v314_v31, %v314_v31  ;;  %v3452_v35 = vld [vmem:[#allocation7 + $0x140] sm:$0xff]  }
  0xa0   : > { %3181 = vmatprep.subr.bf16.mxu0 %v3430_v12  ;;  %v3445_v27 = vld [vmem:[#allocation7 + $0xb0] sm:$0xff]   ;;  %v3451_v34 = vld [vmem:[#allocation7 + $0xb8] sm:$0xff]   ;;  %v3455_v39 = vld [vmem:[#allocation7 + $0x100] sm:$0xff]  }
  0xa1   : > { %3202 = vmatpush3.bf16.msra.mxu1 %v3429_v11  ;;  %v315_v36 = vld [vmem:[%s3979_s10 + $0x8] sm:$0xff]  ;;  %896 = vmatprep.mubr.bf16.mxu0 %v2925_v33  ;;  %v3456_v40 = vld [vmem:[#allocation7 + $0x1c0] sm:$0xff]   ;;  %v3458_v42 = vld [vmem:[#allocation7 + $0x148] sm:$0xff]  }
  0xa2   : > { %3203 = vmatprep.subr.bf16.mxu1 %v3432_v14  ;;  %v2926_v37 = vcombine.low %v315_v36, %v315_v36  ;;  %v2927_v38 = vcombine.high %v315_v36, %v315_v36  ;;  %v3457_v41 = vld [vmem:[#allocation7 + $0x180] sm:$0xff]   ;;  %v3459_v43 = vld [vmem:[#allocation7 + $0x108] sm:$0xff]   ;;  %v3462_v46 = vld [vmem:[#allocation7 + $0x150] sm:$0xff]   ;;  %v3745_v14 = vmov 0.0  }
  0xa3   : > { %3182 = vmatpush3.bf16.msra.mxu0 %v3431_v13  ;;  %v3460_v44 = vld [vmem:[#allocation7 + $0x1c8] sm:$0xff]   ;;  %v3463_v47 = vld [vmem:[#allocation7 + $0x110] sm:$0xff]   ;;  %v3466_v50 = vld [vmem:[#allocation7 + $0x158] sm:$0xff]  }
  0xa4   : > { %3183 = vmatprep.subr.bf16.mxu0 %v3434_v16  ;;  %936 = vmatprep.mubr.bf16.mxu1 %v2927_v38  ;;  %v3461_v45 = vld [vmem:[#allocation7 + $0x188] sm:$0xff]   ;;  %v3464_v48 = vld [vmem:[#allocation7 + $0x1d0] sm:$0xff]   ;;  %v3467_v51 = vld [vmem:[#allocation7 + $0x118] sm:$0xff]  }
  0xa5   : > { %3204 = vmatpush3.bf16.msra.mxu1 %v3433_v15  ;;  %v3465_v49 = vld [vmem:[#allocation7 + $0x190] sm:$0xff]   ;;  %v3468_v52 = vld [vmem:[#allocation7 + $0x1d8] sm:$0xff]   ;;  %v3470_v54 = vld [vmem:[#allocation7 + $0x160] sm:$0xff]  }
  0xa6   : > { %3205 = vmatprep.subr.bf16.mxu1 %v3436_v18  ;;  %v3469_v53 = vld [vmem:[#allocation7 + $0x198] sm:$0xff]   ;;  %v3471_v55 = vld [vmem:[#allocation7 + $0x120] sm:$0xff]   ;;  %v3474_v58 = vld [vmem:[#allocation7 + $0x168] sm:$0xff]  }
  0xa7   : > { %3184 = vmatpush3.bf16.msra.mxu0 %v3435_v17  ;;  %v3472_v56 = vld [vmem:[#allocation7 + $0x1e0] sm:$0xff]   ;;  %v3475_v59 = vld [vmem:[#allocation7 + $0x128] sm:$0xff]   ;;  %v3478_v62 = vld [vmem:[#allocation7 + $0x170] sm:$0xff]  }
  0xa8   : > { %3185 = vmatprep.subr.bf16.mxu0 %v3438_v20  ;;  %v3473_v57 = vld [vmem:[#allocation7 + $0x1a0] sm:$0xff]   ;;  %v3476_v60 = vld [vmem:[#allocation7 + $0x1e8] sm:$0xff]   ;;  %v3479_v63 = vld [vmem:[#allocation7 + $0x130] sm:$0xff]  }
  0xa9   : > { %3206 = vmatpush3.bf16.msra.mxu1 %v3437_v19  ;;  %v3477_v61 = vld [vmem:[#allocation7 + $0x1a8] sm:$0xff]   ;;  %v3480_v0 = vld [vmem:[#allocation7 + $0x1f0] sm:$0xff]   ;;  %v3482_v2 = vld [vmem:[#allocation7 + $0x178] sm:$0xff]  }
  0xaa   : > { %3207 = vmatprep.subr.bf16.mxu1 %v3440_v22  ;;  %v3481_v1 = vld [vmem:[#allocation7 + $0x1b0] sm:$0xff]   ;;  %v3483_v3 = vld [vmem:[#allocation7 + $0x138] sm:$0xff]   ;;  %v3488_v9 = vld [vmem:[#allocation7 + $0x240] sm:$0xff]  }
  0xab   : > { %3186 = vmatpush3.bf16.msra.mxu0 %v3439_v21  ;;  %v3484_v4 = vld [vmem:[#allocation7 + $0x1f8] sm:$0xff]   ;;  %v317_v10 = vld [vmem:[%s3979_s10 + $0x18] sm:$0xff]  ;;  %v3493_v16 = vld [vmem:[#allocation7 + $0x248] sm:$0xff]  }
  0xac   : > { %3187 = vmatprep.subr.bf16.mxu0 %v3442_v24  ;;  %v316_v5 = vld [vmem:[%s3979_s10 + $0x10] sm:$0xff]  ;;  %v2930_v11 = vcombine.low %v317_v10, %v317_v10  ;;  %v2931_v12 = vcombine.high %v317_v10, %v317_v10  ;;  %v3491_v13 = vld [vmem:[#allocation7 + $0x200] sm:$0xff]   ;;  %v3494_v17 = vld [vmem:[#allocation7 + $0x208] sm:$0xff]   ;;  %s3171_s10 = sshll.u32 %s3800_s22, 7  ;;  %s3748_s22 = smov [#allocation10]  }
  0xad   : > { %3208 = vmatpush3.bf16.msra.mxu1 %v3441_v23  ;;  %v2928_v6 = vcombine.low %v316_v5, %v316_v5  ;;  %v2929_v7 = vcombine.high %v316_v5, %v316_v5  ;;  %v3487_v8 = vld [vmem:[#allocation7 + $0x1b8] sm:$0xff]   ;;  %v3492_v15 = vld [vmem:[#allocation7 + $0x280] sm:$0xff]   ;;  %v3495_v18 = vld [vmem:[#allocation7 + $0x288] sm:$0xff]   ;;  %s4091_s24 = scalar_lea.hbm %s4139_s5, %s3171_s10  ;;  %s3661_s13 = sshll.u32 %s3748_s22, 4  ;;  %s3662_s13 = int_to_ptr.vmem [resolvable:$false] %s3661_s13 }
  0xae   : > { %3209 = vmatprep.subr.bf16.mxu1 %v3444_v26  ;;  %v3496_v19 = vld [vmem:[#allocation7 + $0x250] sm:$0xff]   ;;  %v3499_v22 = vld [vmem:[#allocation7 + $0x258] sm:$0xff]   ;;  %v3502_v24 = vld [vmem:[#allocation7 + $0x260] sm:$0xff]   ;;  %s3663_s14 = scalar_lea.vmem %s3662_s13, 256  ;;  %p3664_p5 = scmp.lt.s32.totalorder %s4093_s12, %s3662_s13 }
  0xaf   : > { %3188 = vmatpush3.bf16.msra.mxu0 %v3443_v25  ;;  %v3497_v20 = vld [vmem:[#allocation7 + $0x210] sm:$0xff]   ;;  %v3500_v23 = vld [vmem:[#allocation7 + $0x218] sm:$0xff]   ;;  %v3503_v26 = vld [vmem:[#allocation7 + $0x220] sm:$0xff]   ;;  %p3665_p11 = scmp.lt.s32.totalorder %s3663_s14, %s3657_s28 }
  0xb0   : > { %3189 = vmatprep.subr.bf16.mxu0 %v3446_v28  ;;  %v3498_v21 = vld [vmem:[#allocation7 + $0x290] sm:$0xff]   ;;  %v3501_v25 = vld [vmem:[#allocation7 + $0x298] sm:$0xff]   ;;  %v3504_v28 = vld [vmem:[#allocation7 + $0x2a0] sm:$0xff]  }
  0xb1   : > { %3210 = vmatpush3.bf16.msra.mxu1 %v3445_v27  ;;  %v3505_v27 = vld [vmem:[#allocation7 + $0x268] sm:$0xff]   ;;  %v3511_v36 = vld [vmem:[#allocation7 + $0x278] sm:$0xff]   ;;  %p3666_p2 = por %p3665_p11, %p3664_p5 }
  0xb2   : > { %3211 = vmatprep.subr.bf16.mxu1 %v3448_v30  ;;  %v3508_v30 = vld [vmem:[#allocation7 + $0x270] sm:$0xff]   ;;  %v3507_v31 = vld [vmem:[#allocation7 + $0x2a8] sm:$0xff]   ;;  %v3515_v38 = vld [vmem:[#allocation7 + $0x2b8] sm:$0xff]  }
  0xb3   : > { %3190 = vmatpush3.bf16.msra.mxu0 %v3447_v29  ;;  %v3506_v29 = vld [vmem:[#allocation7 + $0x228] sm:$0xff]   ;;  %p3667_p4 = pnand %p3666_p2, %p3660_p12 }
  0xb4   : > { %3219 = vmatprep.subr.bf16.mxu0 %v3452_v35  ;;  %v1025_v33 = vld [vmem:[%s3987_s11] sm:$0xff] }
  0xb5   : > { %3212 = vmatpush3.bf16.msra.mxu1 %v3451_v34  ;;  %v3510_v34 = vld [vmem:[#allocation7 + $0x2b0] sm:$0xff]   ;;  %v2998_v35 = vcombine.high %v1025_v33, %v1025_v33  ;;  %v1395_v10 = vld [vmem:[#allocation8 + $0x328] sm:$0xff] }
  0xb6   : > { %897 = vmatmul.mubr.bf16.vlgmr.msra.gmra.mrb[0].mxu0 %v2924_v32  ;;  %3241 = vmatprep.subr.bf16.mxu1 %v3456_v40  ;;  %v3509_v32 = vld [vmem:[#allocation7 + $0x230] sm:$0xff]  }
  0xb7   : > { %3220 = vmatpush3.bf16.msra.mxu0 %v3455_v39  ;;  %976 = vmatprep.mubr.bf16.mxu0 %v2929_v7  ;;  %v2997_v39 = vcombine.low %v1025_v33, %v1025_v33  ;;  %v3516_v40 = vld [vmem:[%s3987_s11 + $0x8] ss:$0 sps:$4 sm:$0xff]   ;;  %v1391_v7 = vld [vmem:[#allocation8 + $0x300] sm:$0xff] }
  0xb8   : > { %937 = vmatmul.mubr.bf16.vlgmr.msra.gmra.mrb[0].mxu1 %v2926_v37  ;;  %3221 = vmatprep.subr.bf16.mxu0 %v3458_v42  ;;  %v3512_v37 = vld [vmem:[#allocation7 + $0x238] sm:$0xff]   ;;  %v1370_v42 = vld [vmem:[#allocation8 + $0x220] sm:$0xff] }
  0xb9   : > { %3242 = vmatpush3.bf16.msra.mxu1 %v3457_v41  ;;  %1016 = vmatprep.mubr.bf16.mxu1 %v2931_v12  ;;  %v1367_v41 = vld [vmem:[#allocation8 + $0x200] sm:$0xff] }
  0xba   : > { %3243 = vmatprep.subr.bf16.mxu1 %v3460_v44  ;;  %v3025_v44 = vcombine.high %v1367_v41, %v1370_v42 }
  0xbb   : > { %3222 = vmatpush3.bf16.msra.mxu0 %v3459_v43  ;;  %v1368_v43 = vld [vmem:[#allocation8 + $0x208] sm:$0xff] }
  0xbc   : > { %3223 = vmatprep.subr.bf16.mxu0 %v3462_v46  ;;  %v3024_v46 = vcombine.low %v1367_v41, %v1370_v42  ;;  %v4016_v42 = vld [vmem:[#allocation8 + $0x210] sm:$0xff] }
  0xbd   : > { %3244 = vmatpush3.bf16.msra.mxu1 %v3461_v45  ;;  %v1371_v45 = vld [vmem:[#allocation8 + $0x228] sm:$0xff] }
  0xbe   : > { %3245 = vmatprep.subr.bf16.mxu1 %v3464_v48  ;;  %v3027_v48 = vcombine.high %v1368_v43, %v1371_v45 }
  0xbf   : > { %3224 = vmatpush3.bf16.msra.mxu0 %v3463_v47  ;;  %v3026_v47 = vcombine.low %v1368_v43, %v1371_v45  ;;  %v4018_v43 = vld [vmem:[#allocation8 + $0x230] sm:$0xff] }
  0xc0   : > { %3225 = vmatprep.subr.bf16.mxu0 %v3466_v50  ;;  %v1376_v50 = vld [vmem:[#allocation8 + $0x260] sm:$0xff]  ;;  %v3029_v45 = vcombine.high %v4016_v42, %v4018_v43 }
  0xc1   : > { %3246 = vmatpush3.bf16.msra.mxu1 %v3465_v49  ;;  %v1373_v49 = vld [vmem:[#allocation8 + $0x240] sm:$0xff] }
  0xc2   : > { %3247 = vmatprep.subr.bf16.mxu1 %v3468_v52  ;;  %v3031_v52 = vcombine.high %v1373_v49, %v1376_v50 }
  0xc3   : > { %3226 = vmatpush3.bf16.msra.mxu0 %v3467_v51  ;;  %v1374_v51 = vld [vmem:[#allocation8 + $0x248] sm:$0xff] }
  0xc4   : > { %3227 = vmatprep.subr.bf16.mxu0 %v3470_v54  ;;  %v1379_v54 = vld [vmem:[#allocation8 + $0x280] sm:$0xff] }
  0xc5   : > { %3248 = vmatpush3.bf16.msra.mxu1 %v3469_v53  ;;  %v1377_v53 = vld [vmem:[#allocation8 + $0x268] sm:$0xff] }
  0xc6   : > { %3249 = vmatprep.subr.bf16.mxu1 %v3472_v56  ;;  %v3030_v56 = vcombine.low %v1373_v49, %v1376_v50  ;;  %v3747_v50 = vmov 0  }
  0xc7   : > { %3228 = vmatpush3.bf16.msra.mxu0 %v3471_v55  ;;  %v1382_v55 = vld [vmem:[#allocation8 + $0x2a0] sm:$0xff] }
  0xc8   : > { %3229 = vmatprep.subr.bf16.mxu0 %v3474_v58  ;;  %v1380_v58 = vld [vmem:[#allocation8 + $0x288] sm:$0xff] }
  0xc9   : > { %3250 = vmatpush3.bf16.msra.mxu1 %v3473_v57  ;;  %v3033_v57 = vcombine.high %v1374_v51, %v1377_v53 }
  0xca   : > { %3251 = vmatprep.subr.bf16.mxu1 %v3476_v60  ;;  %v3032_v60 = vcombine.low %v1374_v51, %v1377_v53 }
  0xcb   : > { %3230 = vmatpush3.bf16.msra.mxu0 %v3475_v59  ;;  %v1383_v59 = vld [vmem:[#allocation8 + $0x2a8] sm:$0xff] }
  0xcc   : > { %3231 = vmatprep.subr.bf16.mxu0 %v3478_v62  ;;  %v3039_v62 = vcombine.high %v1380_v58, %v1383_v59 }
  0xcd   : > { %3252 = vmatpush3.bf16.msra.mxu1 %v3477_v61  ;;  %v3037_v61 = vcombine.high %v1379_v54, %v1382_v55 }
  0xce   : > { %3253 = vmatprep.subr.bf16.mxu1 %v3480_v0  ;;  %v1388_v0 = vld [vmem:[#allocation8 + $0x2e0] sm:$0xff] }
  0xcf   : > { %3232 = vmatpush3.bf16.msra.mxu0 %v3479_v63  ;;  %v1385_v63 = vld [vmem:[#allocation8 + $0x2c0] sm:$0xff] }
  0xd0   : > { %3233 = vmatprep.subr.bf16.mxu0 %v3482_v2  ;;  %v1389_v2 = vld [vmem:[#allocation8 + $0x2e8] sm:$0xff]  ;;  %v3043_v5 = vcombine.high %v1385_v63, %v1388_v0 }
  0xd1   : > { %3254 = vmatpush3.bf16.msra.mxu1 %v3481_v1  ;;  %v1386_v1 = vld [vmem:[#allocation8 + $0x2c8] sm:$0xff] }
  0xd2   : > { %3255 = vmatprep.subr.bf16.mxu1 %v3484_v4  ;;  %v3038_v4 = vcombine.low %v1380_v58, %v1383_v59  ;;  %v3044_v12 = vcombine.low %v1386_v1, %v1389_v2 }
  0xd3   : > { %3234 = vmatpush3.bf16.msra.mxu0 %v3483_v3  ;;  %v3036_v3 = vcombine.low %v1379_v54, %v1382_v55 }
  0xd4   : > { %3263 = vmatprep.subr.bf16.mxu0 %v3488_v9  ;;  %v1392_v9 = vld [vmem:[#allocation8 + $0x308] sm:$0xff] }
  0xd5   : > { %3256 = vmatpush3.bf16.msra.mxu1 %v3487_v8  ;;  %v1394_v8 = vld [vmem:[#allocation8 + $0x320] sm:$0xff] }
  0xd6   : > { %977 = vmatmul.mubr.bf16.vlgmr.msra.gmra.mrb[4].mxu0 %v2928_v6  ;;  %3316 = vmatprep.subr.bf16.mxu1 %v3745_v14  ;;  %v3045_v6 = vcombine.high %v1386_v1, %v1389_v2 }
  0xd7   : > { %3264 = vmatpush3.bf16.msra.mxu0 %v3491_v13  ;;  %1268 = vmatprep.mubr.bf16.mxu0 %v2998_v35  ;;  %v3049_v13 = vcombine.high %v1391_v7, %v1394_v8  ;;  %v1412_v35 = vld [vmem:[#allocation8 + $0x3e0] sm:$0xff] }
  0xd8   : > { %1017 = vmatmul.mubr.bf16.vlgmr.msra.gmra.mrb[4].mxu1 %v2930_v11  ;;  %3265 = vmatprep.subr.bf16.mxu0 %v3493_v16  ;;  %v3042_v11 = vcombine.low %v1385_v63, %v1388_v0  ;;  %v1397_v16 = vld [vmem:[#allocation8 + $0x340] sm:$0xff] }
  0xd9   : > { %3317 = vmatpush3.bf16.msra.mxu1 %v3492_v15  ;;  %3332 = vmatprep.mubr.msk.bf16.mxu1 %vm3746_vm0, %v3745_v14  ;;  %v3051_v15 = vcombine.high %v1392_v9, %v1395_v10 }
  0xda   : > { %3318 = vmatprep.subr.bf16.mxu1 %v3745_v14 }
  0xdb   : > { %3266 = vmatpush3.bf16.msra.mxu0 %v3494_v17  ;;  %v1400_v17 = vld [vmem:[#allocation8 + $0x360] sm:$0xff] }
  0xdc   : > { %3267 = vmatprep.subr.bf16.mxu0 %v3496_v19  ;;  %v1401_v19 = vld [vmem:[#allocation8 + $0x368] sm:$0xff] }
  0xdd   : > { %3319 = vmatpush3.bf16.msra.mxu1 %v3495_v18  ;;  %v1398_v18 = vld [vmem:[#allocation8 + $0x348] sm:$0xff] }
  0xde   : > { %3320 = vmatprep.subr.bf16.mxu1 %v3745_v14 }
  0xdf   : > { %3268 = vmatpush3.bf16.msra.mxu0 %v3497_v20  ;;  %v3048_v20 = vcombine.low %v1391_v7, %v1394_v8 }
  0xe0   : > { %3269 = vmatprep.subr.bf16.mxu0 %v3499_v22  ;;  %v3055_v22 = vcombine.high %v1397_v16, %v1400_v17 }
  0xe1   : > { %3321 = vmatpush3.bf16.msra.mxu1 %v3498_v21  ;;  %v3050_v21 = vcombine.low %v1392_v9, %v1395_v10 }
  0xe2   : > { %3322 = vmatprep.subr.bf16.mxu1 %v3745_v14 }
  0xe3   : > { %3270 = vmatpush3.bf16.msra.mxu0 %v3500_v23  ;;  %v3057_v23 = vcombine.high %v1398_v18, %v1401_v19 }
  0xe4   : > { %3271 = vmatprep.subr.bf16.mxu0 %v3502_v24  ;;  %v3054_v24 = vcombine.low %v1397_v16, %v1400_v17 }
  0xe5   : > { %3323 = vmatpush3.bf16.msra.mxu1 %v3501_v25  ;;  %v3056_v25 = vcombine.low %v1398_v18, %v1401_v19 }
  0xe6   : > { %3324 = vmatprep.subr.bf16.mxu1 %v3745_v14 }
  0xe7   : > { %3272 = vmatpush3.bf16.msra.mxu0 %v3503_v26  ;;  %v1403_v26 = vld [vmem:[#allocation8 + $0x380] sm:$0xff] }
  0xe8   : > { %3273 = vmatprep.subr.bf16.mxu0 %v3505_v27  ;;  %v1406_v27 = vld [vmem:[#allocation8 + $0x3a0] sm:$0xff] }
  0xe9   : > { %3325 = vmatpush3.bf16.msra.mxu1 %v3504_v28  ;;  %v1404_v28 = vld [vmem:[#allocation8 + $0x388] sm:$0xff] }
  0xea   : > { %3326 = vmatprep.subr.bf16.mxu1 %v3745_v14 }
  0xeb   : > { %3274 = vmatpush3.bf16.msra.mxu0 %v3506_v29  ;;  %v3061_v29 = vcombine.high %v1403_v26, %v1406_v27 }
  0xec   : > { %3275 = vmatprep.subr.bf16.mxu0 %v3508_v30  ;;  %v1407_v30 = vld [vmem:[#allocation8 + $0x3a8] sm:$0xff] }
  0xed   : > { %3327 = vmatpush3.bf16.msra.mxu1 %v3507_v31  ;;  %v3060_v31 = vcombine.low %v1403_v26, %v1406_v27  ;;  %v3063_v33 = vcombine.high %v1404_v28, %v1407_v30  ;;  %v1378_v26 = vld [vmem:[#allocation8 + $0x270] sm:$0xff]  ;;  %v1324_v27 = vld [vmem:[#allocation8 + $0x40] sm:$0xff] }
  0xee   : > { %3328 = vmatprep.subr.bf16.mxu1 %v3745_v14 }
  0xef   : > { %3276 = vmatpush3.bf16.msra.mxu0 %v3509_v32  ;;  %v3062_v32 = vcombine.low %v1404_v28, %v1407_v30  ;;  %v1327_v28 = vld [vmem:[#allocation8 + $0x60] sm:$0xff] }
  0xf0   : > { %3277 = vmatprep.subr.bf16.mxu0 %v3511_v36  ;;  %v1410_v36 = vld [vmem:[#allocation8 + $0x3c8] sm:$0xff] }
  0xf1   : > { %3329 = vmatpush3.bf16.msra.mxu1 %v3510_v34  ;;  %v1409_v34 = vld [vmem:[#allocation8 + $0x3c0] sm:$0xff] }
  0xf2   : > { %3330 = vmatprep.subr.bf16.mxu1 %v3745_v14 }
  0xf3   : > { %3278 = vmatpush3.bf16.msra.mxu0 %v3512_v37  ;;  %v3067_v37 = vcombine.high %v1409_v34, %v1412_v35 }
  0xf4   : > { %1655 = vmatprep.subr.bf16.mxu0 %v3025_v44  ;;  %v4020_v44 = vld [vmem:[#allocation8] sm:$0xff] }
  0xf5   : > { %3331 = vmatpush3.bf16.msra.mxu1 %v3515_v38  ;;  %v1413_v38 = vld [vmem:[#allocation8 + $0x3e8] sm:$0xff] }
  0xf6   : > { %1269 = vmatmul.mubr.bf16.vlgmr.msra.gmra.mrb[8].mxu0 %v2997_v39  ;;  %1696 = vmatprep.subr.bf16.mxu1 %v3027_v48  ;;  %v3066_v39 = vcombine.low %v1409_v34, %v1412_v35  ;;  %v3069_v41 = vcombine.high %v1410_v36, %v1413_v38  ;;  %v1384_v34 = vld [vmem:[#allocation8 + $0x2b0] sm:$0xff]  ;;  %v1330_v35 = vld [vmem:[#allocation8 + $0x80] sm:$0xff] }
  0xf7   : > { %1656 = vmatpush1.bf16.msra.mxu0 %v3024_v46  ;;  %v1321_v46 = vld [vmem:[#allocation8 + $0x20] sm:$0xff]  ;;  %1687 = vmatprep.mubr.bf16.mxu0 %v3747_v50 }
  0xf8   : > { %3333 = vmatmul.mubr.bf16.vlgmr.msra.gmra.mrb[8].mxu1 %v3516_v40  ;;  %1657 = vmatprep.subr.bf16.mxu0 %v3031_v52  ;;  %v3068_v40 = vcombine.low %v1410_v36, %v1413_v38  ;;  %v3072_v48 = vcombine.low %v4020_v44, %v1321_v46  ;;  %v3073_v49 = vcombine.high %v4020_v44, %v1321_v46  ;;  %v2923_v52 = vld [vmem:[%s4138_s4] ss:$0 sm:$0xff]  ;;  %v1333_v36 = vld [vmem:[#allocation8 + $0xa0] sm:$0xff] }
  0xf9   : > { %1697 = vmatpush1.bf16.msra.mxu1 %v3026_v47  ;;  %v3028_v47 = vcombine.low %v4016_v42, %v4018_v43  ;;  %1728 = vmatprep.mubr.bf16.mxu1 %v3747_v50  ;;  %v3078_v38 = vcombine.low %v1324_v27, %v1327_v28  ;;  %v1390_v42 = vld [vmem:[#allocation8 + $0x2f0] sm:$0xff]  ;;  %v1336_v43 = vld [vmem:[#allocation8 + $0xc0] sm:$0xff]  ;;  %v3084_v46 = vcombine.low %v1330_v35, %v1333_v36 }
  0xfa   : > { %1698 = vmatprep.subr.bf16.mxu1 %v3033_v57  ;;  %v1339_v44 = vld [vmem:[#allocation8 + $0xe0] sm:$0xff] }
  0xfb   : > { %1658 = vmatpush1.bf16.msra.mxu0 %v3030_v56 }
  0xfc   : > { %1659 = vmatprep.subr.bf16.mxu0 %v3037_v61 }
  0xfd   : > { %1699 = vmatpush1.bf16.msra.mxu1 %v3032_v60 }
  0xfe   : > { %1700 = vmatprep.subr.bf16.mxu1 %v3039_v62 }
  0xff   : > { %1660 = vmatpush1.bf16.msra.mxu0 %v3036_v3 }
 0x100   : > { %1661 = vmatprep.subr.bf16.mxu0 %v3043_v5 }
 0x101   : > { %1701 = vmatpush1.bf16.msra.mxu1 %v3038_v4 }
 0x102   : > { %1702 = vmatprep.subr.bf16.mxu1 %v3045_v6 }
 0x103   : > { %1662 = vmatpush1.bf16.msra.mxu0 %v3042_v11 }
 0x104   : > { %1663 = vmatprep.subr.bf16.mxu0 %v3049_v13 }
 0x105   : > { %1703 = vmatpush1.bf16.msra.mxu1 %v3044_v12 }
 0x106   : > { %1704 = vmatprep.subr.bf16.mxu1 %v3051_v15  ;;  %v2996_v15 = vld [vmem:[%s4138_s4 + $0x1] ss:$0 sm:$0xff] }
 0x107   : > { %1664 = vmatpush1.bf16.msra.mxu0 %v3048_v20 }
 0x108   : > { %1665 = vmatprep.subr.bf16.mxu0 %v3055_v22 }
 0x109   : > { %1705 = vmatpush1.bf16.msra.mxu1 %v3050_v21 }
 0x10a   : > { %1706 = vmatprep.subr.bf16.mxu1 %v3057_v23 }
 0x10b   : > { %1666 = vmatpush1.bf16.msra.mxu0 %v3054_v24 }
 0x10c   : > { %1667 = vmatprep.subr.bf16.mxu0 %v3061_v29 }
 0x10d   : > { %1707 = vmatpush1.bf16.msra.mxu1 %v3056_v25  ;;  %v1375_v25 = vld [vmem:[#allocation8 + $0x250] sm:$0xff] }
 0x10e   : > { %1708 = vmatprep.subr.bf16.mxu1 %v3063_v33  ;;  %v1381_v33 = vld [vmem:[#allocation8 + $0x290] sm:$0xff] }
 0x10f   : > { %1668 = vmatpush1.bf16.msra.mxu0 %v3060_v31  ;;  %v3035_v31 = vcombine.high %v1375_v25, %v1378_v26 }
 0x110   : > { %1669 = vmatprep.subr.bf16.mxu0 %v3067_v37  ;;  %v3034_v37 = vcombine.low %v1375_v25, %v1378_v26 }
 0x111   : > { %1709 = vmatpush1.bf16.msra.mxu1 %v3062_v32  ;;  %v3079_v32 = vcombine.high %v1324_v27, %v1327_v28 }
 0x112   : > { %1710 = vmatprep.subr.bf16.mxu1 %v3069_v41  ;;  %v1387_v41 = vld [vmem:[#allocation8 + $0x2d0] sm:$0xff] }
 0x113   : > { %1670 = vmatpush1.bf16.msra.mxu0 %v3066_v39  ;;  %v3041_v39 = vcombine.high %v1381_v33, %v1384_v34 }
 0x114   : > { %1737 = vmatprep.subr.bf16.mxu0 %v3029_v45  ;;  %v3040_v45 = vcombine.low %v1381_v33, %v1384_v34  ;;  %v1329_v33 = vld [vmem:[#allocation8 + $0x70] sm:$0xff] }
 0x115   : > { %1711 = vmatpush1.bf16.msra.mxu1 %v3068_v40  ;;  %v3085_v40 = vcombine.high %v1330_v35, %v1333_v36 }
 0x116   : > { %2018 = vmatprep.subr.bf16.mxu1 %v3073_v49  ;;  %v1393_v49 = vld [vmem:[#allocation8 + $0x310] sm:$0xff] }
 0x189   : > { %v3191_v51 = vpop.f32.mrb[0].mxu0 }
 0x18a   : > { %v3192_v53 = vpop.f32.mrb[1].mxu0 }
 0x18b   : > { %v3193_v54 = vadd.f32 %v3192_v53, %v3191_v51  ;;  %v3194_v55 = vpop.f32.mrb[2].mxu0  ;;  %v3213_v56 = vpop.f32.mrb[0].mxu1  ;;  %v1396_v51 = vld [vmem:[#allocation8 + $0x330] sm:$0xff]  ;;  %v1345_v53 = vld [vmem:[#allocation8 + $0x120] sm:$0xff] }
 0x18c   : > { %v3195_v57 = vpop.f32.mrb[3].mxu0  ;;  %v3214_v58 = vpop.f32.mrb[1].mxu1  ;;  %v3090_v55 = vcombine.low %v1336_v43, %v1339_v44 }
 0x18d   : > { %v899_v59 = vadd.f32 %v3193_v54, %v2923_v52  ;;  %v3215_v60 = vadd.f32 %v3214_v58, %v3213_v56  ;;  %v3216_v61 = vpop.f32.mrb[2].mxu1  ;;  %v1342_v52 = vld [vmem:[#allocation8 + $0x100] sm:$0xff]  ;;  %v3046_v54 = vcombine.low %v1387_v41, %v1390_v42  ;;  %v3053_v56 = vcombine.high %v1393_v49, %v1396_v51  ;;  %v1399_v58 = vld [vmem:[#allocation8 + $0x350] sm:$0xff] }
 0x18e   : > { %v3217_v62 = vpop.f32.mrb[3].mxu1  ;;  %v3097_v57 = vcombine.high %v1342_v52, %v1345_v53  ;;  %v1351_v61 = vld [vmem:[#allocation8 + $0x160] sm:$0xff] }
 0x18f   : > { %v939_v63 = vadd.f32 %v3215_v60, %v899_v59  ;;  %v1402_v59 = vld [vmem:[#allocation8 + $0x370] sm:$0xff]  ;;  %v1348_v60 = vld [vmem:[#allocation8 + $0x140] sm:$0xff]  ;;  %v3052_v62 = vcombine.low %v1393_v49, %v1396_v51 }
 0x190   : > { %v1341_v49 = vld [vmem:[#allocation8 + $0xf0] sm:$0xff] }
 0x1a9   : > { %v3235_v0 = vpop.f32.mrb[4].mxu0 }
 0x1aa   : > { %v3236_v1 = vpop.f32.mrb[5].mxu0 }
 0x1ab   : > { %v3237_v2 = vadd.f32 %v3236_v1, %v3235_v0  ;;  %v3238_v3 = vpop.f32.mrb[6].mxu0  ;;  %v3257_v4 = vpop.f32.mrb[4].mxu1  ;;  %v3059_v0 = vcombine.high %v1399_v58, %v1402_v59  ;;  %v3103_v1 = vcombine.high %v1348_v60, %v1351_v61 }
 0x1ac   : > { %v3239_v5 = vpop.f32.mrb[7].mxu0  ;;  %v3258_v7 = vpop.f32.mrb[5].mxu1  ;;  %v1408_v3 = vld [vmem:[#allocation8 + $0x3b0] sm:$0xff] }
 0x1ad   : > { %v979_v6 = vadd.f32 %v3237_v2, %v939_v63  ;;  %v3259_v8 = vadd.f32 %v3258_v7, %v3257_v4  ;;  %v3260_v9 = vpop.f32.mrb[6].mxu1  ;;  %v3096_v63 = vcombine.low %v1342_v52, %v1345_v53  ;;  %v1405_v2 = vld [vmem:[#allocation8 + $0x390] sm:$0xff]  ;;  %v1354_v4 = vld [vmem:[#allocation8 + $0x180] sm:$0xff]  ;;  %v3102_v7 = vcombine.low %v1348_v60, %v1351_v61  ;;  %v1349_v61 = vld [vmem:[#allocation8 + $0x148] sm:$0xff] }
 0x1ae   : > { %v3261_v10 = vpop.f32.mrb[7].mxu1  ;;  %v1357_v5 = vld [vmem:[#allocation8 + $0x1a0] sm:$0xff] }
 0x1af   : > { %v4033_v11 = vadd.f32 %v3259_v8, %v979_v6  ;;  %v3058_v6 = vcombine.low %v1399_v58, %v1402_v59  ;;  %v3065_v8 = vcombine.high %v1405_v2, %v1408_v3  ;;  %v3109_v9 = vcombine.high %v1354_v4, %v1357_v5  ;;  %v1411_v10 = vld [vmem:[#allocation8 + $0x3d0] sm:$0xff] }
 0x1b1   : > { %v1024_v26 = vmax.f32 %v4033_v11, 0.0  ;;  %v1334_v11 = vld [vmem:[#allocation8 + $0xa8] sm:$0xff] }
 0x1b3   : > { %v4045_v36 = vpack.c.bf16 %v1024_v26, %v1024_v26 }
 0x1c9   : > { %v3279_v12 = vpop.f32.mrb[8].mxu0 }
 0x1ca   : > { %v3280_v13 = vpop.f32.mrb[9].mxu0 }
 0x1cb   : > { %v3281_v16 = vadd.f32 %v3280_v13, %v3279_v12  ;;  %v3282_v17 = vpop.f32.mrb[10].mxu0  ;;  %v1310_v18 = vpop.f32.mrb[8].mxu1  ;;  %v1414_v12 = vld [vmem:[#allocation8 + $0x3f0] sm:$0xff]  ;;  %v1360_v13 = vld [vmem:[#allocation8 + $0x1c0] sm:$0xff] }
 0x1cc   : > { %v3283_v19 = vpop.f32.mrb[11].mxu0  ;;  %v3334_v20 = vpop.f32.mrb[9].mxu1  ;;  %v3108_v17 = vcombine.low %v1354_v4, %v1357_v5  ;;  %v1355_v5 = vld [vmem:[#allocation8 + $0x188] sm:$0xff] }
 0x1cd   : > { %v1271_v21 = vadd.f32 %v3281_v16, %v2996_v15  ;;  %v1313_v22 = vpop.f32.mrb[10].mxu1  ;;  %v1363_v15 = vld [vmem:[#allocation8 + $0x1e0] sm:$0xff]  ;;  %v3064_v16 = vcombine.low %v1405_v2, %v1408_v3  ;;  %v1319_v20 = vld [vmem:[#allocation8 + $0x8] sm:$0xff] }
 0x1ce   : > { %v3335_v23 = vpop.f32.mrb[11].mxu1  ;;  %v3115_v19 = vcombine.high %v1360_v13, %v1363_v15  ;;  %v1320_v22 = vld [vmem:[#allocation8 + $0x10] sm:$0xff]  ;;  %v3114_v25 = vcombine.low %v1360_v13, %v1363_v15  ;;  %v1361_v15 = vld [vmem:[#allocation8 + $0x1c8] sm:$0xff] }
 0x1cf   : > { %v1311_v24 = vadd.f32 %v1310_v18, %v1271_v21  ;;  %v3071_v18 = vcombine.high %v1411_v10, %v1414_v12  ;;  %v1322_v21 = vld [vmem:[#allocation8 + $0x28] sm:$0xff]  ;;  %v1323_v23 = vld [vmem:[#allocation8 + $0x30] sm:$0xff] }
 0x1d0   : > { %v3075_v27 = vcombine.high %v1319_v20, %v1322_v21  ;;  %v3077_v28 = vcombine.high %v1320_v22, %v1323_v23  ;;  %v3074_v34 = vcombine.low %v1319_v20, %v1322_v21  ;;  %v3076_v35 = vcombine.low %v1320_v22, %v1323_v23 }
 0x1d1   : > { %v1316_v29 = vmax.f32 %v1311_v24, 0.0  ;;  %v3070_v24 = vcombine.low %v1411_v10, %v1414_v12 }
 0x1d3   : > { %v4038_v30 = vpack.c.bf16 %v1316_v29, %v1316_v29  ;;  %v1325_v29 = vld [vmem:[#allocation8 + $0x48] sm:$0xff] }
 0x1d5   : > { %1688 = vmatmul.mubr.bf16.vlgmr.msra.gmra.mrb[12].mxu0 %v4038_v30  ;;  %1729 = vmatmul.mubr.bf16.vlgmr.msra.gmra.mrb[12].mxu1 %v4038_v30 }
 0x1d6   : > { %1738 = vmatpush1.bf16.msra.mxu0 %v3028_v47  ;;  %2019 = vmatpush1.bf16.msra.mxu1 %v3072_v48  ;;  %v3047_v47 = vcombine.high %v1387_v41, %v1390_v42  ;;  %v3091_v48 = vcombine.high %v1336_v43, %v1339_v44  ;;  %v1335_v41 = vld [vmem:[#allocation8 + $0xb0] sm:$0xff] }
 0x1d7   : > { %1739 = vmatprep.subr.bf16.mxu0 %v3035_v31  ;;  %2020 = vmatprep.subr.bf16.mxu1 %v3079_v32  ;;  %v1328_v31 = vld [vmem:[#allocation8 + $0x68] sm:$0xff]  ;;  %v1326_v32 = vld [vmem:[#allocation8 + $0x50] sm:$0xff] }
 0x1d8   : > { %1769 = vmatprep.mubr.bf16.mxu0 %v3747_v50  ;;  %2050 = vmatprep.mubr.bf16.mxu1 %v3747_v50  ;;  %v3080_v42 = vcombine.low %v1325_v29, %v1328_v31  ;;  %v3082_v43 = vcombine.low %v1326_v32, %v1329_v33 }
 0x1da   : > { %1740 = vmatpush1.bf16.msra.mxu0 %v3034_v37  ;;  %2021 = vmatpush1.bf16.msra.mxu1 %v3078_v38  ;;  %v3081_v37 = vcombine.high %v1325_v29, %v1328_v31  ;;  %v3083_v38 = vcombine.high %v1326_v32, %v1329_v33 }
 0x1db   : > { %1741 = vmatprep.subr.bf16.mxu0 %v3041_v39  ;;  %2022 = vmatprep.subr.bf16.mxu1 %v3085_v40  ;;  %v1331_v39 = vld [vmem:[#allocation8 + $0x88] sm:$0xff]  ;;  %v1332_v40 = vld [vmem:[#allocation8 + $0x90] sm:$0xff] }
 0x1dc   : > { %v3087_v44 = vcombine.high %v1331_v39, %v1334_v11  ;;  %v3088_v51 = vcombine.low %v1332_v40, %v1335_v41 }
 0x1de   : > { %1742 = vmatpush1.bf16.msra.mxu0 %v3040_v45  ;;  %2023 = vmatpush1.bf16.msra.mxu1 %v3084_v46  ;;  %v3089_v45 = vcombine.high %v1332_v40, %v1335_v41  ;;  %v1337_v46 = vld [vmem:[#allocation8 + $0xc8] sm:$0xff] }
 0x1df   : > { %1743 = vmatprep.subr.bf16.mxu0 %v3047_v47  ;;  %2024 = vmatprep.subr.bf16.mxu1 %v3091_v48  ;;  %v1340_v47 = vld [vmem:[#allocation8 + $0xe8] sm:$0xff]  ;;  %v1338_v48 = vld [vmem:[#allocation8 + $0xd0] sm:$0xff] }
 0x1e0   : > { %v3093_v52 = vcombine.high %v1337_v46, %v1340_v47  ;;  %v3095_v53 = vcombine.high %v1338_v48, %v1341_v49  ;;  %v3092_v58 = vcombine.low %v1337_v46, %v1340_v47  ;;  %v3094_v59 = vcombine.low %v1338_v48, %v1341_v49 }
 0x1e2   : > { %1744 = vmatpush1.bf16.msra.mxu0 %v3046_v54  ;;  %2025 = vmatpush1.bf16.msra.mxu1 %v3090_v55  ;;  %v1343_v54 = vld [vmem:[#allocation8 + $0x108] sm:$0xff] }
 0x1e3   : > { %1745 = vmatprep.subr.bf16.mxu0 %v3053_v56  ;;  %2026 = vmatprep.subr.bf16.mxu1 %v3097_v57  ;;  %v1346_v55 = vld [vmem:[#allocation8 + $0x128] sm:$0xff]  ;;  %v1344_v56 = vld [vmem:[#allocation8 + $0x110] sm:$0xff] }
 0x1e4   : > { %v1347_v57 = vld [vmem:[#allocation8 + $0x130] sm:$0xff]  ;;  %v3099_v60 = vcombine.high %v1343_v54, %v1346_v55 }
 0x1e5   : > { %v3100_v2 = vcombine.low %v1344_v56, %v1347_v57 }
 0x1e6   : > { %1746 = vmatpush1.bf16.msra.mxu0 %v3052_v62  ;;  %2027 = vmatpush1.bf16.msra.mxu1 %v3096_v63  ;;  %v1352_v62 = vld [vmem:[#allocation8 + $0x168] sm:$0xff]  ;;  %v1350_v63 = vld [vmem:[#allocation8 + $0x150] sm:$0xff] }
 0x1e7   : > { %1747 = vmatprep.subr.bf16.mxu0 %v3059_v0  ;;  %2028 = vmatprep.subr.bf16.mxu1 %v3103_v1  ;;  %v1353_v0 = vld [vmem:[#allocation8 + $0x170] sm:$0xff]  ;;  %v3098_v1 = vcombine.low %v1343_v54, %v1346_v55  ;;  %v3105_v3 = vcombine.high %v1349_v61, %v1352_v62 }
 0x1e8   : > { %v3107_v4 = vcombine.high %v1350_v63, %v1353_v0  ;;  %v3106_v10 = vcombine.low %v1350_v63, %v1353_v0 }
 0x1ea   : > { %1748 = vmatpush1.bf16.msra.mxu0 %v3058_v6  ;;  %2029 = vmatpush1.bf16.msra.mxu1 %v3102_v7  ;;  %v1358_v6 = vld [vmem:[#allocation8 + $0x1a8] sm:$0xff]  ;;  %v1356_v7 = vld [vmem:[#allocation8 + $0x190] sm:$0xff] }
 0x1eb   : > { %1749 = vmatprep.subr.bf16.mxu0 %v3065_v8  ;;  %2030 = vmatprep.subr.bf16.mxu1 %v3109_v9  ;;  %v1359_v8 = vld [vmem:[#allocation8 + $0x1b0] sm:$0xff]  ;;  %v3104_v9 = vcombine.low %v1349_v61, %v1352_v62  ;;  %v3111_v12 = vcombine.high %v1355_v5, %v1358_v6 }
 0x1ec   : > { %v3113_v13 = vcombine.high %v1356_v7, %v1359_v8  ;;  %v3112_v20 = vcombine.low %v1356_v7, %v1359_v8 }
 0x1ee   : > { %1750 = vmatpush1.bf16.msra.mxu0 %v3064_v16  ;;  %2031 = vmatpush1.bf16.msra.mxu1 %v3108_v17  ;;  %v1364_v16 = vld [vmem:[#allocation8 + $0x1e8] sm:$0xff]  ;;  %v1362_v17 = vld [vmem:[#allocation8 + $0x1d0] sm:$0xff] }
 0x1ef   : > { %1751 = vmatprep.subr.bf16.mxu0 %v3071_v18  ;;  %2032 = vmatprep.subr.bf16.mxu1 %v3115_v19  ;;  %v1365_v18 = vld [vmem:[#allocation8 + $0x1f0] sm:$0xff]  ;;  %v3110_v19 = vcombine.low %v1355_v5, %v1358_v6  ;;  %v3117_v21 = vcombine.high %v1361_v15, %v1364_v16  ;;  %v3116_v23 = vcombine.low %v1361_v15, %v1364_v16 }
 0x1f0   : > { %v3119_v22 = vcombine.high %v1362_v17, %v1365_v18 }
 0x1f2   : > { %1752 = vmatpush1.bf16.msra.mxu0 %v3070_v24  ;;  %2033 = vmatpush1.bf16.msra.mxu1 %v3114_v25  ;;  %v3118_v24 = vcombine.low %v1362_v17, %v1365_v18 }
 0x1f3   : > { %2059 = vmatprep.subr.bf16.mxu0 %v3075_v27  ;;  %2100 = vmatprep.subr.bf16.mxu1 %v3077_v28 }
 0x1f5   : > { %1770 = vmatmul.mubr.bf16.vlgmr.msra.gmra.mrb[16].mxu0 %v4038_v30  ;;  %2051 = vmatmul.mubr.bf16.vlgmr.msra.gmra.mrb[16].mxu1 %v4045_v36  ;;  %v3086_v30 = vcombine.low %v1331_v39, %v1334_v11 }
 0x1f6   : > { %2060 = vmatpush1.bf16.msra.mxu0 %v3074_v34  ;;  %2101 = vmatpush1.bf16.msra.mxu1 %v3076_v35  ;;  %v2142_v34 = vlaneseq }
 0x1f7   : > { %2061 = vmatprep.subr.bf16.mxu0 %v3081_v37  ;;  %2102 = vmatprep.subr.bf16.mxu1 %v3083_v38  ;;  %v311_v38 = vld [vmem:[%s4138_s4 + $0x2] sm:$0x3f] }
 0x1f8   : > { %2091 = vmatprep.mubr.bf16.mxu0 %v3747_v50  ;;  %2132 = vmatprep.mubr.bf16.mxu1 %v3747_v50  ;;  %v3101_v50 = vcombine.high %v1344_v56, %v1347_v57  ;;  %v4053_v35 = vshrl.u32 %v2142_v34, 7 }
 0x1fa   : > { %2062 = vmatpush1.bf16.msra.mxu0 %v3080_v42  ;;  %2103 = vmatpush1.bf16.msra.mxu1 %v3082_v43  ;;  %v2148_v37 = vsub.s32 1, %v4053_v35  ;;  %v2156_v49 = vsub.s32 3, %v4053_v35 }
 0x1fb   : > { %2063 = vmatprep.subr.bf16.mxu0 %v3087_v44  ;;  %2104 = vmatprep.subr.bf16.mxu1 %v3089_v45 }
 0x1fc   : > { %v2157_v55 = vrot.slane %v311_v38, %v2156_v49  ;;  %v2360_v49 = vld [vmem:[#allocation8 + $0x178] sm:$0xff] }
 0x1fe   : > { %2064 = vmatpush1.bf16.msra.mxu0 %v3086_v30  ;;  %2105 = vmatpush1.bf16.msra.mxu1 %v3088_v51  ;;  %v2152_v30 = vsub.s32 2, %v4053_v35  ;;  %v2164_v51 = vsub.s32 5, %v4053_v35 }
 0x1ff   : > { %2065 = vmatprep.subr.bf16.mxu0 %v3093_v52  ;;  %2106 = vmatprep.subr.bf16.mxu1 %v3095_v53  ;;  %v2144_v52 = vsub.s32 0, %v4053_v35 }
 0x200   : > { %v2153_v57 = vrot.slane %v311_v38, %v2152_v30  ;;  %v2165_v63 = vrot.slane %v311_v38, %v2164_v51 }
 0x202   : > { %2066 = vmatpush1.bf16.msra.mxu0 %v3092_v58  ;;  %2107 = vmatpush1.bf16.msra.mxu1 %v3094_v59  ;;  %v2160_v59 = vsub.s32 4, %v4053_v35 }
 0x203   : > { %2067 = vmatprep.subr.bf16.mxu0 %v3099_v60  ;;  %2108 = vmatprep.subr.bf16.mxu1 %v3101_v50 }
 0x204   : > { %v2161_v7 = vrot.slane %v311_v38, %v2160_v59 }
 0x206   : > { %2068 = vmatpush1.bf16.msra.mxu0 %v3098_v1  ;;  %2109 = vmatpush1.bf16.msra.mxu1 %v3100_v2 }
 0x207   : > { %2069 = vmatprep.subr.bf16.mxu0 %v3105_v3  ;;  %2110 = vmatprep.subr.bf16.mxu1 %v3107_v4  ;;  %v2145_v4 = vrot.slane %v311_v38, %v2144_v52 }
 0x20a   : > { %2070 = vmatpush1.bf16.msra.mxu0 %v3104_v9  ;;  %2111 = vmatpush1.bf16.msra.mxu1 %v3106_v10 }
 0x20b   : > { %2071 = vmatprep.subr.bf16.mxu0 %v3111_v12  ;;  %2112 = vmatprep.subr.bf16.mxu1 %v3113_v13 }
 0x20e   : > { %2072 = vmatpush1.bf16.msra.mxu0 %v3110_v19  ;;  %2113 = vmatpush1.bf16.msra.mxu1 %v3112_v20 }
 0x20f   : > { %2073 = vmatprep.subr.bf16.mxu0 %v3117_v21  ;;  %2114 = vmatprep.subr.bf16.mxu1 %v3119_v22 }
 0x212   : > { %2074 = vmatpush1.bf16.msra.mxu0 %v3116_v23  ;;  %2115 = vmatpush1.bf16.msra.mxu1 %v3118_v24 }
 0x215   : > { %2092 = vmatmul.mubr.bf16.vlgmr.msra.gmra.mrb[20].mxu0 %v4045_v36  ;;  %2133 = vmatmul.mubr.bf16.vlgmr.msra.gmra.mrb[20].mxu1 %v4045_v36  ;;  %v2149_v36 = vrot.slane %v311_v38, %v2148_v37  ;;  %v2353_v38 = vld [vmem:[#allocation8 + $0x98] sm:$0xff] }
 0x2a8   : > { %v1689_v25 = vpop.f32.mrb[12].mxu0  ;;  %v1730_v26 = vpop.f32.mrb[12].mxu1 }
 0x2a9   : > { %v1691_v27 = vpop.f32.mrb[13].mxu0  ;;  %v1732_v28 = vpop.f32.mrb[13].mxu1 }
 0x2aa   : > { %v1693_v29 = vpop.f32.mrb[14].mxu0  ;;  %v1734_v31 = vpop.f32.mrb[14].mxu1 }
 0x2ab   : > { %v1694_v32 = vpop.f32.mrb[15].mxu0  ;;  %v1735_v33 = vpop.f32.mrb[15].mxu1  ;;  %v2351_v29 = vld [vmem:[#allocation8 + $0x58] sm:$0xff] }
 0x2ac   : > { %v2352_v33 = vld [vmem:[#allocation8 + $0x78] sm:$0xff] }
 0x2ad   : > { %v3124_v34 = vcombine.high %v2351_v29, %v2352_v33 }
 0x2c8   : > { %v1771_v39 = vpop.f32.mrb[16].mxu0  ;;  %v2052_v11 = vpop.f32.mrb[16].mxu1 }
 0x2c9   : > { %v2053_v40 = vadd.f32 %v2052_v11, %v1689_v25  ;;  %v1773_v41 = vpop.f32.mrb[17].mxu0  ;;  %v2054_v42 = vpop.f32.mrb[17].mxu1  ;;  %v3123_v11 = vcombine.low %v2351_v29, %v2352_v33 }
 0x2ca   : > { %v2055_v43 = vadd.f32 %v2054_v42, %v1691_v27  ;;  %v1775_v44 = vpop.f32.mrb[18].mxu0  ;;  %v2056_v45 = vpop.f32.mrb[18].mxu1  ;;  %v2349_v27 = vld [vmem:[#allocation8 + $0x18] sm:$0xff] }
 0x2cb   : > { %v1776_v46 = vpop.f32.mrb[19].mxu0  ;;  %v2057_v47 = vpop.f32.mrb[19].mxu1  ;;  %v2172_v9 = vadd.f32 %v2145_v4, %v2053_v40  ;;  %v2355_v40 = vld [vmem:[#allocation8 + $0xd8] sm:$0xff] }
 0x2cc   : > { %v2173_v48 = vadd.f32 %v2149_v36, %v2055_v43  ;;  %v2357_v44 = vld [vmem:[#allocation8 + $0x118] sm:$0xff] }
 0x2cd   : > { %v2358_v45 = vld [vmem:[#allocation8 + $0x138] sm:$0xff] }
 0x2ce   : > { %2242 = vmatprep.mubr.f32.mxu1 %v2173_v48  ;;  %v3130_v47 = vcombine.high %v2357_v44, %v2358_v45  ;;  %v2359_v48 = vld [vmem:[#allocation8 + $0x158] sm:$0xff]  ;;  %v3129_v30 = vcombine.low %v2357_v44, %v2358_v45  ;;  %v3519_v44 = vld [vmem:[#allocation7 + $0x308] sm:$0xff]  }
 0x2cf   : > { %v3132_v51 = vcombine.high %v2359_v48, %v2360_v49  ;;  %v2369_v4 = vld [vmem:[#allocation8 + $0x298] sm:$0xff]  ;;  %v3520_v45 = vld [vmem:[#allocation7 + $0x2c8] sm:$0xff]  }
 0x2e8   : > { %v2093_v53 = vpop.f32.mrb[20].mxu0  ;;  %v2134_v54 = vpop.f32.mrb[20].mxu1 }
 0x2e9   : > { %v2094_v56 = vadd.f32 %v2093_v53, %v1730_v26  ;;  %v2135_v58 = vadd.f32 %v2134_v54, %v1771_v39  ;;  %v2095_v60 = vpop.f32.mrb[21].mxu0  ;;  %v2136_v50 = vpop.f32.mrb[21].mxu1  ;;  %v2354_v39 = vld [vmem:[#allocation8 + $0xb8] sm:$0xff] }
 0x2ea   : > { %v2096_v61 = vadd.f32 %v2095_v60, %v1732_v28  ;;  %v2137_v62 = vadd.f32 %v2136_v50, %v1773_v41  ;;  %v2097_v0 = vpop.f32.mrb[22].mxu0  ;;  %v2138_v1 = vpop.f32.mrb[22].mxu1  ;;  %v2350_v28 = vld [vmem:[#allocation8 + $0x38] sm:$0xff]  ;;  %v3126_v36 = vcombine.high %v2353_v38, %v2354_v39  ;;  %v3125_v42 = vcombine.low %v2353_v38, %v2354_v39 }
 0x2eb   : > { %v2098_v2 = vpop.f32.mrb[23].mxu0  ;;  %v2139_v3 = vpop.f32.mrb[23].mxu1  ;;  %v2174_v6 = vadd.f32 %v2153_v57, %v2094_v56  ;;  %v2176_v10 = vadd.f32 %v2161_v7, %v2135_v58  ;;  %v3121_v31 = vcombine.low %v2349_v27, %v2350_v28  ;;  %v3122_v32 = vcombine.high %v2349_v27, %v2350_v28  ;;  %v2356_v41 = vld [vmem:[#allocation8 + $0xf8] sm:$0xff] }
 0x2ec   : > { %v2175_v5 = vadd.f32 %v2157_v55, %v2096_v61  ;;  %v2177_v8 = vadd.f32 %v2165_v63, %v2137_v62  ;;  %v3128_v43 = vcombine.high %v2355_v40, %v2356_v41  ;;  %v3127_v46 = vcombine.low %v2355_v40, %v2356_v41  ;;  %v2361_v53 = vld [vmem:[#allocation8 + $0x198] sm:$0xff] }
 0x2ed   : > { %2552 = vmatprep.subr.bf16.mxu0 %v3122_v32  ;;  %v2362_v54 = vld [vmem:[#allocation8 + $0x1b8] sm:$0xff]  ;;  %v3131_v55 = vcombine.low %v2359_v48, %v2360_v49  ;;  %v3525_v49 = vld [vmem:[#allocation7 + $0x320] sm:$0xff]  }
 0x2ee   : > { %2178 = vmatprep.subr.mxu1 %v2175_v5  ;;  %2553 = vmatpush1.bf16.msra.mxu0 %v3121_v31  ;;  %v3134_v56 = vcombine.high %v2361_v53, %v2362_v54  ;;  %v2363_v57 = vld [vmem:[#allocation8 + $0x1d8] sm:$0xff]  ;;  %v3133_v59 = vcombine.low %v2361_v53, %v2362_v54  ;;  %v3528_v53 = vld [vmem:[#allocation7 + $0x2e8] sm:$0xff]  }
 0x2ef   : > { %2179 = vmatpush1.xpose.msra.mxu1 %v2174_v6  ;;  %2554 = vmatprep.subr.bf16.mxu0 %v3124_v34  ;;  %v2364_v58 = vld [vmem:[#allocation8 + $0x1f8] sm:$0xff] }
 0x2f0   : > { %2276 = vmatprep.subr.mxu1 %v2177_v8  ;;  %v3136_v60 = vcombine.high %v2363_v57, %v2364_v58  ;;  %v2365_v50 = vld [vmem:[#allocation8 + $0x218] sm:$0xff]  ;;  %v3135_v62 = vcombine.low %v2363_v57, %v2364_v58  ;;  %v3529_v58 = vld [vmem:[#allocation7 + $0x330] sm:$0xff]  }
 0x2f1   : > { %v2366_v61 = vld [vmem:[#allocation8 + $0x238] sm:$0xff] }
 0x2f2   : > { %2243 = vmatmul.mubr.f32.vlgmr.msra.gmra.mrb[24].mxu1 %v2172_v9  ;;  %2555 = vmatpush1.bf16.msra.mxu0 %v3123_v11  ;;  %v3138_v63 = vcombine.high %v2365_v50, %v2366_v61  ;;  %v2367_v0 = vld [vmem:[#allocation8 + $0x258] sm:$0xff]  ;;  %v3137_v2 = vcombine.low %v2365_v50, %v2366_v61  ;;  %v312_v61 = vld [vmem:[%s4138_s4 + $0x8] sm:$0x3] }
 0x2f3   : > { %2277 = vmatpush1.msra.mxu1 %v2176_v10  ;;  %2340 = vmatprep.mubr.f32.mxu1 %v3745_v14  ;;  %v2368_v1 = vld [vmem:[#allocation8 + $0x278] sm:$0xff] }
 0x2f4   : > { %2556 = vmatprep.subr.bf16.mxu0 %v3126_v36  ;;  %v3140_v3 = vcombine.high %v2367_v0, %v2368_v1  ;;  %v2370_v5 = vld [vmem:[#allocation8 + $0x2b8] sm:$0xff]  ;;  %v3139_v6 = vcombine.low %v2367_v0, %v2368_v1 }
 0x2f5   : > { %v3142_v7 = vcombine.high %v2369_v4, %v2370_v5  ;;  %v2371_v8 = vld [vmem:[#allocation8 + $0x2d8] sm:$0xff]  ;;  %v3141_v10 = vcombine.low %v2369_v4, %v2370_v5 }
 0x2f6   : > { %2557 = vmatpush1.bf16.msra.mxu0 %v3125_v42  ;;  %v2372_v9 = vld [vmem:[#allocation8 + $0x2f8] sm:$0xff]  ;;  %v3517_v42 = vld [vmem:[#allocation7 + $0x300] sm:$0xff]  }
 0x2f7   : > { %2558 = vmatprep.subr.bf16.mxu0 %v3128_v43  ;;  %v2379_v11 = vld [vmem:[#allocation8 + $0x3d8] sm:$0xff]  ;;  %v3518_v43 = vld [vmem:[#allocation7 + $0x2c0] sm:$0xff]   ;;  %3294 = vmatprep.subr.bf16.mxu1 %v3517_v42 }
 0x2f8   : > { %v2380_v36 = vld [vmem:[#allocation8 + $0x3f8] sm:$0xff] }
 0x2f9   : > { %v3152_v40 = vcombine.high %v2379_v11, %v2380_v36  ;;  %v3151_v41 = vcombine.low %v2379_v11, %v2380_v36  ;;  %v3524_v48 = vld [vmem:[#allocation7 + $0x2d8] sm:$0xff]  }
 0x2fa   : > { %2559 = vmatpush1.bf16.msra.mxu0 %v3127_v46  ;;  %v3521_v46 = vld [vmem:[#allocation7 + $0x310] sm:$0xff]   ;;  %v3532_v50 = vld [vmem:[#allocation7 + $0x2f8] sm:$0xff]  }
 0x2fb   : > { %2560 = vmatprep.subr.bf16.mxu0 %v3130_v47  ;;  %v3522_v47 = vld [vmem:[#allocation7 + $0x2d0] sm:$0xff]  }
 0x2fe   : > { %2561 = vmatpush1.bf16.msra.mxu0 %v3129_v30  ;;  %v3526_v30 = vld [vmem:[#allocation7 + $0x2e0] sm:$0xff]  }
 0x2ff   : > { %2562 = vmatprep.subr.bf16.mxu0 %v3132_v51  ;;  %v3527_v51 = vld [vmem:[#allocation7 + $0x328] sm:$0xff]  }
 0x302   : > { %2563 = vmatpush1.bf16.msra.mxu0 %v3131_v55 }
 0x303   : > { %2564 = vmatprep.subr.bf16.mxu0 %v3134_v56 }
 0x306   : > { %2565 = vmatpush1.bf16.msra.mxu0 %v3133_v59  ;;  %v3530_v59 = vld [vmem:[#allocation7 + $0x2f0] sm:$0xff]  }
 0x307   : > { %2566 = vmatprep.subr.bf16.mxu0 %v3136_v60  ;;  %v3531_v60 = vld [vmem:[#allocation7 + $0x338] sm:$0xff]  }
 0x30a   : > { %2567 = vmatpush1.bf16.msra.mxu0 %v3135_v62  ;;  %v2385_v62 = vrot.slane %v312_v61, %v2144_v52  ;;  %v3153_v52 = vld [vmem:[%s4138_s4 + $0xa] ss:$0 sm:$0xff] }
 0x30b   : > { %2568 = vmatprep.subr.bf16.mxu0 %v3138_v63  ;;  %v2389_v63 = vrot.slane %v312_v61, %v2148_v37 }
 0x30e   : > { %2569 = vmatpush1.bf16.msra.mxu0 %v3137_v2 }
 0x30f   : > { %2570 = vmatprep.subr.bf16.mxu0 %v3140_v3 }
 0x312   : > { %2571 = vmatpush1.bf16.msra.mxu0 %v3139_v6 }
 0x313   : > { %2572 = vmatprep.subr.bf16.mxu0 %v3142_v7 }
 0x316   : > { %2573 = vmatpush1.bf16.msra.mxu0 %v3141_v10 }
 0x3c5   : > { %v2244_v12 = vpop.f32.mrb[24].mxu1 }
 0x3c6   : > { %v2248_v13 = vmul.f32 0.0625, %v2244_v12  ;;  %v2246_v15 = vpop.f32.mrb[25].mxu1  ;;  %v3144_v12 = vcombine.high %v2371_v8, %v2372_v9 }
 0x3c7   : > { %v2374_v15 = vld [vmem:[#allocation8 + $0x338] sm:$0xff] }
 0x3c8   : > { %v2250_v16 = vsel %vm2249_vm1, %v2248_v13, -inf  ;;  %2574 = vmatprep.subr.bf16.mxu0 %v3144_v12 }
 0x3c9   : > { %2251 = vmax.xlane.f32.xlu0 %v2250_v16  ;;  %v3143_v16 = vcombine.low %v2371_v8, %v2372_v9 }
 0x3cb   : > { %2575 = vmatpush1.bf16.msra.mxu0 %v3143_v16 }
 0x456   : > { %v2252_v17 = vpop.xlane.xlu0 %2251 }
 0x457   : > { %v2253_v18 = vrot.slane %v2252_v17, 4 }
 0x459   : > { %v2254_v19 = vmax.f32 %v2252_v17, %v2253_v18  ;;  %v2375_v18 = vld [vmem:[#allocation8 + $0x358] sm:$0xff] }
 0x45b   : > { %v2255_v20 = vrot.slane %v2254_v19, 2 }
 0x45d   : > { %v2256_v21 = vmax.f32 %v2254_v19, %v2255_v20  ;;  %v2376_v19 = vld [vmem:[#allocation8 + $0x378] sm:$0xff] }
 0x45f   : > { %v2257_v22 = vrot.slane %v2256_v21, 1 }
 0x461   : > { %v2258_v23 = vmax.f32 %v2256_v21, %v2257_v22  ;;  %v3148_v21 = vcombine.high %v2375_v18, %v2376_v19  ;;  %v2377_v22 = vld [vmem:[#allocation8 + $0x398] sm:$0xff] }
 0x463   : > { %v2259_v24 = vsub.f32 %v2248_v13, %v2258_v23  ;;  %v2373_v13 = vld [vmem:[#allocation8 + $0x318] sm:$0xff] }
 0x464   : > { %v3146_v17 = vcombine.high %v2373_v13, %v2374_v15  ;;  %v3145_v20 = vcombine.low %v2373_v13, %v2374_v15  ;;  %v2378_v23 = vld [vmem:[#allocation8 + $0x3b8] sm:$0xff] }
 0x465   : > { %v2260_v25 = vmul.f32 1.442695, %v2259_v24  ;;  %v3147_v24 = vcombine.low %v2375_v18, %v2376_v19 }
 0x466   : > { %2576 = vmatprep.subr.bf16.mxu0 %v3146_v17 }
 0x467   : > { %3533 = vpow2.f32 %v2260_v25  ;;  %2577 = vmatpush1.bf16.msra.mxu0 %v3145_v20  ;;  %v3150_v25 = vcombine.high %v2377_v22, %v2378_v23 }
 0x468   : > { %2578 = vmatprep.subr.bf16.mxu0 %v3148_v21 }
 0x46b   : > { %2579 = vmatpush1.bf16.msra.mxu0 %v3147_v24 }
 0x46c   : > { %2580 = vmatprep.subr.bf16.mxu0 %v3150_v25 }
 0x471   : > { %v4070_v26 = vpop.eup %3533 }
 0x472   : > { %v2262_v14 = vsel %vm2249_vm1, %v4070_v26, 0.0 }
 0x473   : > { %2263 = vadd.xlane.f32.xlu0 %v2262_v14  ;;  %v3149_v14 = vcombine.low %v2377_v22, %v2378_v23 }
 0x475   : > { %2581 = vmatpush1.bf16.msra.mxu0 %v3149_v14 }
 0x476   : > { %2582 = vmatprep.subr.bf16.mxu0 %v3152_v40 }
 0x479   : > { %2583 = vmatpush1.bf16.msra.mxu0 %v3151_v41 }
 0x500   : > { %v2264_v27 = vpop.xlane.xlu0 %2263 }
 0x501   : > { %v2265_v28 = vrot.slane %v2264_v27, 4 }
 0x503   : > { %v2266_v29 = vadd.f32 %v2265_v28, %v2264_v27 }
 0x505   : > { %v2267_v31 = vrot.slane %v2266_v29, 2 }
 0x507   : > { %v2268_v32 = vadd.f32 %v2267_v31, %v2266_v29 }
 0x509   : > { %v2269_v33 = vrot.slane %v2268_v32, 1 }
 0x50b   : > { %v2270_v34 = vadd.f32 %v2269_v33, %v2268_v32 }
 0x50d   : > { %3535 = vrcp.f32 %v2270_v34 }
 0x517   : > { %v3536_v38 = vpop.eup %3535 }
 0x518   : > { %v2272_v39 = vmul.f32 %v3536_v38, %v4070_v26  ;;  %v3523_v26 = vld [vmem:[#allocation7 + $0x318] sm:$0xff]  }
 0x51a   : > { %3120 = vmatmul.mubr.msk.f32.vlgmr.msra.gmra.mrb[26].mxu1 %vm2249_vm1, %v2272_v39 }
 0x51b   : > { %3295 = vmatpush3.bf16.msra.mxu1 %v3518_v43 }
 0x51c   : > { %3296 = vmatprep.subr.bf16.mxu1 %v3519_v44 }
 0x51f   : > { %3297 = vmatpush3.bf16.msra.mxu1 %v3520_v45 }
 0x520   : > { %3298 = vmatprep.subr.bf16.mxu1 %v3521_v46 }
 0x523   : > { %3299 = vmatpush3.bf16.msra.mxu1 %v3522_v47 }
 0x524   : > { %3300 = vmatprep.subr.bf16.mxu1 %v3523_v26 }
 0x527   : > { %3301 = vmatpush3.bf16.msra.mxu1 %v3524_v48 }
 0x528   : > { %3302 = vmatprep.subr.bf16.mxu1 %v3525_v49 }
 0x52b   : > { %3303 = vmatpush3.bf16.msra.mxu1 %v3526_v30 }
 0x52c   : > { %3304 = vmatprep.subr.bf16.mxu1 %v3527_v51 }
 0x52f   : > { %3305 = vmatpush3.bf16.msra.mxu1 %v3528_v53 }
 0x530   : > { %3306 = vmatprep.subr.bf16.mxu1 %v3529_v58 }
 0x533   : > { %3307 = vmatpush3.bf16.msra.mxu1 %v3530_v59 }
 0x534   : > { %3308 = vmatprep.subr.bf16.mxu1 %v3531_v60 }
 0x537   : > { %3309 = vmatpush3.bf16.msra.mxu1 %v3532_v50 }
 0x5ed   : > { %v2342_v54 = vpop.f32.mrb[26].mxu1 }
 0x5ee   : > { %v2344_v55 = vpop.f32.mrb[27].mxu1  ;;  %v2347_v57 = vpack.c.bf16 %v2342_v54, %v2342_v54 }
 0x5ef   : > { %v2348_v56 = vpack.c.bf16 %v2344_v55, %v2344_v55 }
 0x5f1   : > { %2584 = vmatprep.mubr.bf16.mxu0 %v2348_v56 }
 0x5f2   : > { %2585 = vmatmul.mubr.bf16.vlgmr.msra.gmra.mrb[24].mxu0 %v2347_v57 }
 0x6c5   : > { %v2586_v0 = vpop.f32.mrb[24].mxu0 }
 0x6c6   : > { %v2587_v1 = vadd.f32 %v2586_v0, %v2385_v62  ;;  %v2588_v2 = vpop.f32.mrb[25].mxu0 }
 0x6c7   : > { %v2589_v3 = vadd.f32 %v2588_v2, %v2389_v63  ;;  %v2590_v4 = vpop.f32.mrb[26].mxu0 }
 0x6c8   : > { %v2593_v5 = vmax.f32 %v2587_v1, 0.0  ;;  %v2591_v6 = vpop.f32.mrb[27].mxu0 }
 0x6c9   : > { %v2594_v7 = vmax.f32 %v2589_v3, 0.0 }
 0x6ca   : > { %v2595_v9 = vpack.c.bf16 %v2593_v5, %v2593_v5 }
 0x6cb   : > { %v2596_v8 = vpack.c.bf16 %v2594_v7, %v2594_v7 }
 0x6cd   : > { %2763 = vmatprep.mubr.bf16.mxu1 %v2596_v8 }
 0x6ce   : > { %2764 = vmatmul.mubr.bf16.vlgmr.msra.gmra.mrb[28].mxu1 %v2595_v9 }
 0x7a1   : > { %v3310_v10 = vpop.f32.mrb[28].mxu1 }
 0x7a2   : > { %v3311_v35 = vpop.f32.mrb[29].mxu1 }
 0x7a3   : > { %v3312_v37 = vadd.f32 %v3311_v35, %v3310_v10  ;;  %v3313_v12 = vpop.f32.mrb[30].mxu1 }
 0x7a4   : > { %v3314_v13 = vpop.f32.mrb[31].mxu1 }
 0x7a5   : > { %v2766_v15 = vadd.f32 %v3312_v37, %v3153_v52 }
 0x7a7   : > { %2771 = vmax.xlane.f32.xlu1 %v2766_v15 }
 0x834   : > { %v2772_v16 = vpop.xlane.xlu1 %2771 }
 0x835   : > { %v2773_v17 = vsub.f32 %v2766_v15, %v2772_v16 }
 0x837   : > { %v2774_v18 = vmul.f32 1.442695, %v2773_v17 }
 0x839   : > { %3537 = vpow2.f32 %v2774_v18 }
 0x843   : > { %v3538_v19 = vpop.eup %3537 }
 0x844   : > { %2776 = vadd.xlane.f32.xlu1 %v3538_v19 }
 0x8d1   : > { %v2777_v20 = vpop.xlane.xlu1 %2776 }
 0x8d2   : > { %3539 = vlog2.f32 %v2777_v20 }
 0x8dc   : > { %v3540_v21 = vpop.eup %3539 }
 0x8dd   : > { %v2779_v22 = vmul.f32 0.6931472, %v3540_v21 }
 0x8df   : > { %v2780_v23 = vadd.f32 %v2779_v22, %v2772_v16 }
 0x8e1   : > { %v2781_v24 = vsub.f32 %v2766_v15, %v2780_v23 }
 0x8e3   : > { %2782 = vst [vmem:[%s307_s26] sm:$0xff] %v2781_v24 }
 0x8e4   : > { %3670 = shalt.err (!%p3667_p4)
}
 0x8e5   : > { %s3671_s0 = scalar_lea.hbm %s4091_s24, 128  ;;  %s3675_s7 = scalar_lea.hbm %s4139_s5, 512 }
 0x8e6   : > { %p3672_p1 = scmp.ne.s32.totalorder %s4091_s24, %s3671_s0  ;;  %p3676_p0 = scmp.lt.u32.totalorder %s4091_s24, %s4139_s5 }
 0x8e7   : > { %p3677_p8 = scmp.lt.u32.totalorder %s3675_s7, %s3671_s0  ;;  %p3679_p3 = scmp.lt.u32.totalorder %s3671_s0, %s4091_s24 }
 0x8e8   : > { %p3673_p6 = pnand %p3672_p1, %p4160_p7 }
 0x8e9   : > { %p3678_p13 = por %p3677_p8, %p3676_p0 }
 0x8ea   : > { %p3674_p10 = pneg %p3673_p6 }
 0x8eb   : > { %p3680_p9 = por %p3679_p3, %p3678_p13 }
 0x8ed   : > { %p3681_p12 = pnand %p3680_p9, %p3674_p10 }
 0x8ef   : > { %3684 = shalt.err (!%p3681_p12)
}
 0x8f0   : > { %3351 = dma.vmem_to_hbm [thread:$0]  (%p4160_p7), %s4093_s12, 128, %s4091_s24, %s2784_s8  }
 0x8f1 PF: > { %p3376_p5 = scmp.ge.s32.totalorder %s3735_s21, 2  ;;  %s2809_s29 = sand.u32 1, %s3723_s18  }
 0x8f2   : > { %p4161_p11 = scmp.ne.s32.totalorder %s4146_s25, 0  ;;  %s2810_s10 = scalar_lea.sflag [#allocation4], %s2809_s29 }
 0x8f4   : > { %p3368_p2 = pnand %p3376_p5, %p4161_p11 }
 0x8f6   : > { %3718 = dma.done.wait (!%p3368_p2), %s2810_s10, 128  }
 0x8f7   : > { %3720 = vsyncadd (!%p3368_p2), %s2810_s10, 4294967168  ;;  %p22_p4 = scmp.ge.s32.totalorder %s3881_s16, 6   ;;  %s4162_s18 = smov %s3727_s19 }
 0x8f8   : > { %s4163_s19 = smov %s3731_s20  ;;  %s4164_s20 = smov %s3890_s27 }
 0x8f9   : > { %s4165_s21 = smov %s3881_s16  ;;  %24 = sbr.rel (!%p22_p4) target bundleno = 10 (0xa), region = 106 }
 0x900   :  { %2815 = vsyncpa [#allocation3], 1 }
 0x901   :  { %2817 = vsyncpa [#allocation3 + $0x1], 1 }
 0x902   :  { %2818 = vsyncpa [#allocation6], 1 }
 0x903   :  { %2820 = vsyncpa [#allocation6 + $0x1], 1 }
 0x904   :  { %2821 = vsyncpa [#allocation9], 1 }
 0x905   :  { %2822 = vsyncpa [#allocation4], 1 }
 0x906   :  { %2824 = vsyncpa [#allocation4 + $0x1], 1 }

</bundles_post_ra>
